<compile_context>
chip_gen: v6e
topology: v6e:2x2x1
jax: 0.10.0
libtpu: 0.0.40
codegen_flags: <defaults>
</compile_context>

<pallas_src>
import functools

import jax
import jax.numpy as jnp
import numpy as np
from jax.experimental import pallas as pl
from jax.experimental.pallas import tpu as pltpu


# ---------------------------------------------------------------------------
# Fused kernel: all GIN layers + final Linear + sigmoid in one body.
# Per grid step (one graph), refs are (leading graph dim squeezed away):
#   adj : [NP, NP] bf16  adjacency with (1+eps)*I folded into the diagonal
#   x   : [NP, CP] f32   zero-padded node features
#   w_l : [CP, CP] bf16  Linear weight, pre-transposed ([in, out]), zero-padded
#   p_l : [5,  CP] f32   rows = [bias, s1, t1, s2, t2]  (folded BN affines;
#                        the last layer uses only the bias row -- its BNs are
#                        folded into the head on the host)
#   head: [2,  CP] f32   row 0 = folded head weight, [1,0] = folded head bias
#   out : [NP, CP] f32   sigmoid(logit) broadcast across lanes (lane-dense)
# ---------------------------------------------------------------------------
def fused_gin_kernel(*refs, num_layers):
    adj_ref, x_ref = refs[0], refs[1]
    layer_refs = refs[2:2 + 2 * num_layers]
    head_ref = refs[2 + 2 * num_layers]
    out_ref = refs[3 + 2 * num_layers]

    h = x_ref[...]                                    # f32 [NP, CP]

    for l in range(num_layers):                       # statically unrolled
        w_ref = layer_refs[2 * l]
        p_ref = layer_refs[2 * l + 1]

        # GINConv aggregation: (1+eps)*x + adj @ x, with the self-term folded
        # into the adjacency diagonal on the host.  bf16 x bf16 MXU operands,
        # f32 accumulation (native MXU rate on v5e/v6e/v7x).
        agg = jnp.dot(adj_ref[...], h.astype(jnp.bfloat16),
                      preferred_element_type=jnp.float32)

        # Linear (+bias) on bf16 MXU operands; ReLU + folded BN affines in f32.
        t = jnp.dot(agg.astype(jnp.bfloat16), w_ref[...],
                    preferred_element_type=jnp.float32) + p_ref[0:1, :]
        t = jnp.maximum(t, 0.0)

        if l != num_layers - 1:
            t = t * p_ref[1:2, :] + p_ref[2:3, :]     # inner BN (folded affine)
            t = jnp.maximum(t, 0.0)                   # F.relu; dropout = id (eval)
            t = t * p_ref[3:4, :] + p_ref[4:5, :]     # outer BN (folded affine)
        # last layer: its (fused) BN affine was folded into the head on host.
        h = t

    # Head: [NP, CP] x [CP, 1] mat-vec as VPU multiply + lane (XLU) reduction.
    # All transcendental / divide work happens on the narrow [NP, 1] column.
    logit = jnp.sum(h * head_ref[0:1, :], axis=-1, keepdims=True) \
        + head_ref[1:2, 0:1]                          # scalar bias -> [NP, 1]
    sig = pl.reciprocal(1.0 + jnp.exp(-logit), approx=True)      # sigmoid (EUP)
    out_ref[...] = jnp.broadcast_to(sig, out_ref.shape)          # lane-dense store


# ---------------------------------------------------------------------------
# Host-side folding / padding + the single pallas_call wrapper.
# ---------------------------------------------------------------------------
def _pad2(a, rows, cols, dtype=jnp.float32):
    out = jnp.zeros((rows, cols), dtype)
    return out.at[:a.shape[0], :a.shape[1]].set(a.astype(dtype))


def _padv(v, cols):
    out = jnp.zeros((cols,), jnp.float32)
    return out.at[:v.shape[0]].set(v.astype(jnp.float32))


def bn_affine(gamma, beta, mean, var, eps=1e-5):
    """Fold eval-mode BatchNorm1d into per-channel (scale, shift), shape [C]."""
    scale = gamma / jnp.sqrt(var + eps)
    shift = beta - mean * scale
    return scale.astype(jnp.float32), shift.astype(jnp.float32)


def gin_forward(adj, x, ws, bs, bn_conv, bn_outer, w_final, b_final):
    """adj: [N,N] or [G,N,N]; x: [N,C_in] or [G,N,C_in]. Shared weights."""
    single = (adj.ndim == 2)
    if single:
        adj, x = adj[None], x[None]
    num_layers = len(ws)
    g, n = x.shape[0], x.shape[1]
    n_pad = max(128, ((n + 127) // 128) * 128)
    c_pad = 128

    # Fold the eps=0 self-term into the adjacency, pad, store in bf16 (0/1 exact).
    eye = jnp.eye(n, dtype=adj.dtype)
    adj_p = jnp.zeros((g, n_pad, n_pad), jnp.bfloat16)
    adj_p = adj_p.at[:, :n, :n].set((adj + eye).astype(jnp.bfloat16))
    x_p = jnp.zeros((g, n_pad, c_pad), jnp.float32)
    x_p = x_p.at[:, :n, :x.shape[2]].set(x.astype(jnp.float32))

    layer_ops = []
    s_last = t_last = None
    for l in range(num_layers):
        w = _pad2(ws[l], c_pad, c_pad, jnp.bfloat16)          # bf16 MXU operand
        s1, t1 = bn_conv[l]
        s2, t2 = bn_outer[l]
        if l == num_layers - 1:
            # No ReLU between the two BNs on the last layer -> fold them, then
            # fold the combined affine into the head (below).
            s_last = s1 * s2
            t_last = t1 * s2 + t2
            zero = jnp.zeros((c_pad,), jnp.float32)
            p = jnp.stack([_padv(bs[l], c_pad), zero, zero, zero, zero], axis=0)
        else:
            p = jnp.stack([_padv(bs[l], c_pad), _padv(s1, c_pad), _padv(t1, c_pad),
                           _padv(s2, c_pad), _padv(t2, c_pad)], axis=0)   # [5, CP]
        layer_ops += [w, p]

    # Fold last-layer affine (s,t) into the head: w' = s*w, b' = t.w + b (exact).
    wf = w_final[:, 0].astype(jnp.float32)
    head_w = s_last * wf
    head_b = jnp.sum(t_last * wf) + b_final[0].astype(jnp.float32)
    head = jnp.zeros((2, c_pad), jnp.float32)
    head = head.at[0, :head_w.shape[0]].set(head_w)
    head = head.at[1, 0].set(head_b)

    graph_spec = lambda shp: pl.BlockSpec((None,) + shp, lambda gi: (gi, 0, 0))
    const_spec = lambda shp: pl.BlockSpec(shp, lambda gi: (0, 0))
    in_specs = [graph_spec((n_pad, n_pad)), graph_spec((n_pad, c_pad))]
    for l in range(num_layers):
        in_specs += [const_spec((c_pad, c_pad)), const_spec((5, c_pad))]
    in_specs += [const_spec((2, c_pad))]

    # VMEM budget (double-buffered operands + live f32 intermediates) + headroom.
    in_bytes = (n_pad * n_pad * 2 + n_pad * c_pad * 4
                + num_layers * (c_pad * c_pad * 2 + 5 * c_pad * 4) + 2 * c_pad * 4)
    out_bytes = n_pad * c_pad * 4
    scratch_est = 8 * n_pad * c_pad * 4 + n_pad * n_pad * 2
    vmem_limit = int(min(64 << 20,
                         2 * (in_bytes + out_bytes) + scratch_est + (8 << 20)))

    flops = g * (num_layers * (2 * n_pad * n_pad * c_pad + 2 * n_pad * c_pad * c_pad)
                 + 2 * n_pad * c_pad)
    bytes_accessed = g * (n_pad * n_pad * 2 + 2 * n_pad * c_pad * 4) \
        + num_layers * (c_pad * c_pad * 2 + 5 * c_pad * 4) + 2 * c_pad * 4

    out_padded = pl.pallas_call(
        functools.partial(fused_gin_kernel, num_layers=num_layers),
        out_shape=jax.ShapeDtypeStruct((g, n_pad, c_pad), jnp.float32),
        grid=(g,),
        in_specs=in_specs,
        out_specs=pl.BlockSpec((None, n_pad, c_pad), lambda gi: (gi, 0, 0)),
        compiler_params=pltpu.CompilerParams(
            dimension_semantics=("parallel",),          # v7x: shard graphs over TCs
            vmem_limit_bytes=vmem_limit),
        cost_estimate=pl.CostEstimate(flops=int(flops),
                                      transcendentals=int(2 * g * n_pad),
                                      bytes_accessed=int(bytes_accessed)),
    )(adj_p, x_p, *layer_ops, head)

    out = out_padded[:, :n, :1]
    return out[0] if single else out


# ---------------------------------------------------------------------------
if __name__ == "__main__":
    # Small shapes consistent with the module.  NOTE: the last GINConv's internal
    # BatchNorm1d(hidden_channels) is applied to an out_channels-wide tensor, so
    # the PyTorch module only runs when out_channels == hidden_channels.
    G, N, C_IN, HID, C_OUT, NUM_LAYERS = 2, 64, 16, 32, 32, 3

    key = jax.random.PRNGKey(0)
    keys = jax.random.split(key, 64)

    xs = jax.random.normal(keys[0], (G, N, C_IN), jnp.float32)
    adjs = (jax.random.uniform(keys[1], (G, N, N)) < 0.1).astype(jnp.float32)
    adjs = jnp.maximum(adjs, jnp.swapaxes(adjs, 1, 2))          # symmetric
    adjs = adjs * (1.0 - jnp.eye(N, dtype=jnp.float32))         # no self loops

    dims = [C_IN] + [HID] * (NUM_LAYERS - 1) + [C_OUT]
    ws, bs, bn_conv, bn_outer = [], [], [], []
    ki = 2
    for layer in range(NUM_LAYERS):
        cin, cout = dims[layer], dims[layer + 1]
        ws.append(jax.random.normal(keys[ki], (cin, cout), jnp.float32) * 0.1); ki += 1
        bs.append(jax.random.normal(keys[ki], (cout,), jnp.float32) * 0.1); ki += 1
        # Randomized eval-mode BatchNorm statistics so the affine folding is exercised.
        for dst in (bn_conv, bn_outer):
            gamma = 0.5 + jax.random.uniform(keys[ki], (cout,), jnp.float32); ki += 1
            beta = jax.random.normal(keys[ki], (cout,), jnp.float32) * 0.1; ki += 1
            rmean = jax.random.normal(keys[ki], (cout,), jnp.float32) * 0.1; ki += 1
            rvar = 0.5 + jax.random.uniform(keys[ki], (cout,), jnp.float32); ki += 1
            dst.append(bn_affine(gamma, beta, rmean, rvar))
    w_final = jax.random.normal(keys[ki], (C_OUT, 1), jnp.float32) * 0.1; ki += 1
    b_final = jax.random.normal(keys[ki], (1,), jnp.float32) * 0.1

    # --- fused Pallas forward (batched over G graphs, shared weights) ---
    out = gin_forward(adjs, xs, ws, bs, bn_conv, bn_outer, w_final, b_final)
    out = jax.block_until_ready(out)

    # --- pure-JAX reference (unfolded, f32) ---
    def reference(adj, x):
        hh = x
        for layer in range(NUM_LAYERS):
            agg = hh + adj @ hh
            t = agg @ ws[layer] + bs[layer]
            t = jnp.maximum(t, 0.0)
            s1, sh1 = bn_conv[layer]
            t = t * s1 + sh1
            if layer != NUM_LAYERS - 1:
                t = jnp.maximum(t, 0.0)       # relu; dropout is identity in eval
            s2, sh2 = bn_outer[layer]
            hh = t * s2 + sh2
        return jax.nn.sigmoid(hh @ w_final + b_final)

    assert out.shape == (G, N, 1)
    # Tolerance relaxed vs. pure-f32 because both matmuls now use bf16 MXU
    # operands (native-rate MXU path); accumulation stays f32.
    for gi in range(G):
        ref = jax.block_until_ready(reference(adjs[gi], xs[gi]))
        np.testing.assert_allclose(np.asarray(out[gi]), np.asarray(ref),
                                   rtol=2e-2, atol=2e-2)
    print("KERNEL_OK")
</pallas_src>

<mosaic_0001>
module attributes {stable_mosaic.version = 11 : i64} {
  func.func @fused_gin_kernel(%arg0: i32, %arg1: memref<1x128x128xbf16, #tpu.memory_space<vmem>>, %arg2: memref<1x128x128xf32, #tpu.memory_space<vmem>>, %arg3: memref<128x128xbf16, #tpu.memory_space<vmem>>, %arg4: memref<5x128xf32, #tpu.memory_space<vmem>>, %arg5: memref<128x128xbf16, #tpu.memory_space<vmem>>, %arg6: memref<5x128xf32, #tpu.memory_space<vmem>>, %arg7: memref<128x128xbf16, #tpu.memory_space<vmem>>, %arg8: memref<5x128xf32, #tpu.memory_space<vmem>>, %arg9: memref<2x128xf32, #tpu.memory_space<vmem>>, %arg10: memref<1x128x128xf32, #tpu.memory_space<vmem>>) attributes {dimension_semantics = [#tpu.dimension_semantics<parallel>], iteration_bounds = array<i64: 2>, scalar_prefetch = 0 : i64, scratch_operands = 0 : i64, tpu.core_type = #tpu.core_type<tc>, window_params = [{transform_indices = @transform_0, window_bounds = array<i64: 1, 128, 128>}, {transform_indices = @transform_1, window_bounds = array<i64: 1, 128, 128>}, {pipeline_mode = #tpu.pipeline_mode<synchronous>, transform_indices = @transform_2, window_bounds = array<i64: 128, 128>}, {pipeline_mode = #tpu.pipeline_mode<synchronous>, transform_indices = @transform_3, window_bounds = array<i64: 5, 128>}, {pipeline_mode = #tpu.pipeline_mode<synchronous>, transform_indices = @transform_4, window_bounds = array<i64: 128, 128>}, {pipeline_mode = #tpu.pipeline_mode<synchronous>, transform_indices = @transform_5, window_bounds = array<i64: 5, 128>}, {pipeline_mode = #tpu.pipeline_mode<synchronous>, transform_indices = @transform_6, window_bounds = array<i64: 128, 128>}, {pipeline_mode = #tpu.pipeline_mode<synchronous>, transform_indices = @transform_7, window_bounds = array<i64: 5, 128>}, {pipeline_mode = #tpu.pipeline_mode<synchronous>, transform_indices = @transform_8, window_bounds = array<i64: 2, 128>}, {transform_indices = @transform_9, window_bounds = array<i64: 1, 128, 128>}]} {
    %c0 = arith.constant 0 : index
    %c0_0 = arith.constant 0 : index
    %c0_1 = arith.constant 0 : index
    %0 = vector.load %arg2[%c0, %c0_0, %c0_1] : memref<1x128x128xf32, #tpu.memory_space<vmem>>, vector<1x128x128xf32>
    %1 = vector.shape_cast %0 : vector<1x128x128xf32> to vector<128x128xf32>
    %c0_2 = arith.constant 0 : index
    %c0_3 = arith.constant 0 : index
    %c0_4 = arith.constant 0 : index
    %2 = vector.load %arg1[%c0_2, %c0_3, %c0_4] : memref<1x128x128xbf16, #tpu.memory_space<vmem>>, vector<1x128x128xbf16>
    %3 = vector.shape_cast %2 : vector<1x128x128xbf16> to vector<128x128xbf16>
    %4 = arith.truncf %1 : vector<128x128xf32> to vector<128x128xbf16>
    %cst = arith.constant dense<0.000000e+00> : vector<128x128xf32>
    %5 = tpu.matmul %3, %4, %cst {dimension_numbers = #tpu.dot_dimension_numbers<[1], [0], [0], [1], [0, 0, 1, 1], [], []>} : vector<128x128xbf16>, vector<128x128xbf16>, vector<128x128xf32> -> vector<128x128xf32>
    %6 = arith.truncf %5 : vector<128x128xf32> to vector<128x128xbf16>
    %c0_5 = arith.constant 0 : index
    %c0_6 = arith.constant 0 : index
    %7 = vector.load %arg3[%c0_5, %c0_6] : memref<128x128xbf16, #tpu.memory_space<vmem>>, vector<128x128xbf16>
    %cst_7 = arith.constant dense<0.000000e+00> : vector<128x128xf32>
    %8 = tpu.matmul %6, %7, %cst_7 {dimension_numbers = #tpu.dot_dimension_numbers<[1], [0], [0], [1], [0, 0, 1, 1], [], []>} : vector<128x128xbf16>, vector<128x128xbf16>, vector<128x128xf32> -> vector<128x128xf32>
    %c0_8 = arith.constant 0 : index
    %c0_9 = arith.constant 0 : index
    %9 = vector.load %arg4[%c0_8, %c0_9] : memref<5x128xf32, #tpu.memory_space<vmem>>, vector<1x128xf32>
    %10 = vector.broadcast %9 : vector<1x128xf32> to vector<128x128xf32>
    %11 = arith.addf %8, %10 : vector<128x128xf32>
    %cst_10 = arith.constant 0.000000e+00 : f32
    %12 = vector.broadcast %cst_10 : f32 to vector<128x128xf32>
    %13 = arith.maximumf %11, %12 : vector<128x128xf32>
    %c1 = arith.constant 1 : index
    %c0_11 = arith.constant 0 : index
    %14 = vector.load %arg4[%c1, %c0_11] : memref<5x128xf32, #tpu.memory_space<vmem>>, vector<1x128xf32>
    %15 = vector.broadcast %14 : vector<1x128xf32> to vector<128x128xf32>
    %16 = arith.mulf %13, %15 : vector<128x128xf32>
    %c2 = arith.constant 2 : index
    %c0_12 = arith.constant 0 : index
    %17 = vector.load %arg4[%c2, %c0_12] : memref<5x128xf32, #tpu.memory_space<vmem>>, vector<1x128xf32>
    %18 = vector.broadcast %17 : vector<1x128xf32> to vector<128x128xf32>
    %19 = arith.addf %16, %18 : vector<128x128xf32>
    %cst_13 = arith.constant 0.000000e+00 : f32
    %20 = vector.broadcast %cst_13 : f32 to vector<128x128xf32>
    %21 = arith.maximumf %19, %20 : vector<128x128xf32>
    %c3 = arith.constant 3 : index
    %c0_14 = arith.constant 0 : index
    %22 = vector.load %arg4[%c3, %c0_14] : memref<5x128xf32, #tpu.memory_space<vmem>>, vector<1x128xf32>
    %23 = vector.broadcast %22 : vector<1x128xf32> to vector<128x128xf32>
    %24 = arith.mulf %21, %23 : vector<128x128xf32>
    %c4 = arith.constant 4 : index
    %c0_15 = arith.constant 0 : index
    %25 = vector.load %arg4[%c4, %c0_15] : memref<5x128xf32, #tpu.memory_space<vmem>>, vector<1x128xf32>
    %26 = vector.broadcast %25 : vector<1x128xf32> to vector<128x128xf32>
    %27 = arith.addf %24, %26 : vector<128x128xf32>
    %c0_16 = arith.constant 0 : index
    %c0_17 = arith.constant 0 : index
    %c0_18 = arith.constant 0 : index
    %28 = vector.load %arg1[%c0_16, %c0_17, %c0_18] : memref<1x128x128xbf16, #tpu.memory_space<vmem>>, vector<1x128x128xbf16>
    %29 = vector.shape_cast %28 : vector<1x128x128xbf16> to vector<128x128xbf16>
    %30 = arith.truncf %27 : vector<128x128xf32> to vector<128x128xbf16>
    %cst_19 = arith.constant dense<0.000000e+00> : vector<128x128xf32>
    %31 = tpu.matmul %29, %30, %cst_19 {dimension_numbers = #tpu.dot_dimension_numbers<[1], [0], [0], [1], [0, 0, 1, 1], [], []>} : vector<128x128xbf16>, vector<128x128xbf16>, vector<128x128xf32> -> vector<128x128xf32>
    %32 = arith.truncf %31 : vector<128x128xf32> to vector<128x128xbf16>
    %c0_20 = arith.constant 0 : index
    %c0_21 = arith.constant 0 : index
    %33 = vector.load %arg5[%c0_20, %c0_21] : memref<128x128xbf16, #tpu.memory_space<vmem>>, vector<128x128xbf16>
    %cst_22 = arith.constant dense<0.000000e+00> : vector<128x128xf32>
    %34 = tpu.matmul %32, %33, %cst_22 {dimension_numbers = #tpu.dot_dimension_numbers<[1], [0], [0], [1], [0, 0, 1, 1], [], []>} : vector<128x128xbf16>, vector<128x128xbf16>, vector<128x128xf32> -> vector<128x128xf32>
    %c0_23 = arith.constant 0 : index
    %c0_24 = arith.constant 0 : index
    %35 = vector.load %arg6[%c0_23, %c0_24] : memref<5x128xf32, #tpu.memory_space<vmem>>, vector<1x128xf32>
    %36 = vector.broadcast %35 : vector<1x128xf32> to vector<128x128xf32>
    %37 = arith.addf %34, %36 : vector<128x128xf32>
    %cst_25 = arith.constant 0.000000e+00 : f32
    %38 = vector.broadcast %cst_25 : f32 to vector<128x128xf32>
    %39 = arith.maximumf %37, %38 : vector<128x128xf32>
    %c1_26 = arith.constant 1 : index
    %c0_27 = arith.constant 0 : index
    %40 = vector.load %arg6[%c1_26, %c0_27] : memref<5x128xf32, #tpu.memory_space<vmem>>, vector<1x128xf32>
    %41 = vector.broadcast %40 : vector<1x128xf32> to vector<128x128xf32>
    %42 = arith.mulf %39, %41 : vector<128x128xf32>
    %c2_28 = arith.constant 2 : index
    %c0_29 = arith.constant 0 : index
    %43 = vector.load %arg6[%c2_28, %c0_29] : memref<5x128xf32, #tpu.memory_space<vmem>>, vector<1x128xf32>
    %44 = vector.broadcast %43 : vector<1x128xf32> to vector<128x128xf32>
    %45 = arith.addf %42, %44 : vector<128x128xf32>
    %cst_30 = arith.constant 0.000000e+00 : f32
    %46 = vector.broadcast %cst_30 : f32 to vector<128x128xf32>
    %47 = arith.maximumf %45, %46 : vector<128x128xf32>
    %c3_31 = arith.constant 3 : index
    %c0_32 = arith.constant 0 : index
    %48 = vector.load %arg6[%c3_31, %c0_32] : memref<5x128xf32, #tpu.memory_space<vmem>>, vector<1x128xf32>
    %49 = vector.broadcast %48 : vector<1x128xf32> to vector<128x128xf32>
    %50 = arith.mulf %47, %49 : vector<128x128xf32>
    %c4_33 = arith.constant 4 : index
    %c0_34 = arith.constant 0 : index
    %51 = vector.load %arg6[%c4_33, %c0_34] : memref<5x128xf32, #tpu.memory_space<vmem>>, vector<1x128xf32>
    %52 = vector.broadcast %51 : vector<1x128xf32> to vector<128x128xf32>
    %53 = arith.addf %50, %52 : vector<128x128xf32>
    %c0_35 = arith.constant 0 : index
    %c0_36 = arith.constant 0 : index
    %c0_37 = arith.constant 0 : index
    %54 = vector.load %arg1[%c0_35, %c0_36, %c0_37] : memref<1x128x128xbf16, #tpu.memory_space<vmem>>, vector<1x128x128xbf16>
    %55 = vector.shape_cast %54 : vector<1x128x128xbf16> to vector<128x128xbf16>
    %56 = arith.truncf %53 : vector<128x128xf32> to vector<128x128xbf16>
    %cst_38 = arith.constant dense<0.000000e+00> : vector<128x128xf32>
    %57 = tpu.matmul %55, %56, %cst_38 {dimension_numbers = #tpu.dot_dimension_numbers<[1], [0], [0], [1], [0, 0, 1, 1], [], []>} : vector<128x128xbf16>, vector<128x128xbf16>, vector<128x128xf32> -> vector<128x128xf32>
    %58 = arith.truncf %57 : vector<128x128xf32> to vector<128x128xbf16>
    %c0_39 = arith.constant 0 : index
    %c0_40 = arith.constant 0 : index
    %59 = vector.load %arg7[%c0_39, %c0_40] : memref<128x128xbf16, #tpu.memory_space<vmem>>, vector<128x128xbf16>
    %cst_41 = arith.constant dense<0.000000e+00> : vector<128x128xf32>
    %60 = tpu.matmul %58, %59, %cst_41 {dimension_numbers = #tpu.dot_dimension_numbers<[1], [0], [0], [1], [0, 0, 1, 1], [], []>} : vector<128x128xbf16>, vector<128x128xbf16>, vector<128x128xf32> -> vector<128x128xf32>
    %c0_42 = arith.constant 0 : index
    %c0_43 = arith.constant 0 : index
    %61 = vector.load %arg8[%c0_42, %c0_43] : memref<5x128xf32, #tpu.memory_space<vmem>>, vector<1x128xf32>
    %62 = vector.broadcast %61 : vector<1x128xf32> to vector<128x128xf32>
    %63 = arith.addf %60, %62 : vector<128x128xf32>
    %cst_44 = arith.constant 0.000000e+00 : f32
    %64 = vector.broadcast %cst_44 : f32 to vector<128x128xf32>
    %65 = arith.maximumf %63, %64 : vector<128x128xf32>
    %c0_45 = arith.constant 0 : index
    %c0_46 = arith.constant 0 : index
    %66 = vector.load %arg9[%c0_45, %c0_46] : memref<2x128xf32, #tpu.memory_space<vmem>>, vector<1x128xf32>
    %67 = vector.broadcast %66 : vector<1x128xf32> to vector<128x128xf32>
    %68 = arith.mulf %65, %67 : vector<128x128xf32>
    %cst_47 = arith.constant dense<0.000000e+00> : vector<128xf32>
    %69 = vector.multi_reduction <add>, %68, %cst_47 [1] : vector<128x128xf32> to vector<128xf32>
    %70 = vector.shape_cast %69 : vector<128xf32> to vector<128x1xf32>
    %c1_48 = arith.constant 1 : index
    %c0_49 = arith.constant 0 : index
    %71 = vector.load %arg9[%c1_48, %c0_49] : memref<2x128xf32, #tpu.memory_space<vmem>>, vector<1x1xf32>
    %72 = vector.broadcast %71 : vector<1x1xf32> to vector<128x1xf32>
    %73 = arith.addf %70, %72 : vector<128x1xf32>
    %cst_50 = arith.constant 0.000000e+00 : f32
    %74 = vector.broadcast %cst_50 : f32 to vector<128x1xf32>
    %75 = arith.subf %74, %73 : vector<128x1xf32>
    %76 = math.exp %75 : vector<128x1xf32>
    %cst_51 = arith.constant 1.000000e+00 : f32
    %77 = vector.broadcast %cst_51 : f32 to vector<128x1xf32>
    %78 = arith.addf %77, %76 : vector<128x1xf32>
    %79 = tpu.reciprocal %78 {approx = true} : vector<128x1xf32> -> vector<128x1xf32>
    %80 = vector.shape_cast %79 : vector<128x1xf32> to vector<128x1xf32>
    %81 = vector.broadcast %80 : vector<128x1xf32> to vector<128x128xf32>
    %c0_52 = arith.constant 0 : index
    %c0_53 = arith.constant 0 : index
    %c0_54 = arith.constant 0 : index
    %82 = vector.load %arg10[%c0_52, %c0_53, %c0_54] : memref<1x128x128xf32, #tpu.memory_space<vmem>>, vector<1x128x128xf32>
    %83 = vector.shape_cast %82 : vector<1x128x128xf32> to vector<128x128xf32>
    %84 = vector.shape_cast %81 : vector<128x128xf32> to vector<1x128x128xf32>
    tpu.vector_store %arg10[%c0_52, %c0_53, %c0_54], %84 {strides = array<i32>} : memref<1x128x128xf32, #tpu.memory_space<vmem>>, vector<1x128x128xf32>,
    return
  }
  func.func @transform_0(%arg0: i32) -> (i32, i32, i32) {
    %c0_i32 = arith.constant 0 : i32
    %c0_i32_0 = arith.constant 0 : i32
    %c0_i32_1 = arith.constant 0 : i32
    return %arg0, %c0_i32, %c0_i32_0 : i32, i32, i32
  }
  func.func @transform_1(%arg0: i32) -> (i32, i32, i32) {
    %c0_i32 = arith.constant 0 : i32
    %c0_i32_0 = arith.constant 0 : i32
    %c0_i32_1 = arith.constant 0 : i32
    return %arg0, %c0_i32, %c0_i32_0 : i32, i32, i32
  }
  func.func @transform_2(%arg0: i32) -> (i32, i32) {
    %c0_i32 = arith.constant 0 : i32
    %c0_i32_0 = arith.constant 0 : i32
    %c0_i32_1 = arith.constant 0 : i32
    return %c0_i32, %c0_i32_0 : i32, i32
  }
  func.func @transform_3(%arg0: i32) -> (i32, i32) {
    %c0_i32 = arith.constant 0 : i32
    %c0_i32_0 = arith.constant 0 : i32
    %c0_i32_1 = arith.constant 0 : i32
    return %c0_i32, %c0_i32_0 : i32, i32
  }
  func.func @transform_4(%arg0: i32) -> (i32, i32) {
    %c0_i32 = arith.constant 0 : i32
    %c0_i32_0 = arith.constant 0 : i32
    %c0_i32_1 = arith.constant 0 : i32
    return %c0_i32, %c0_i32_0 : i32, i32
  }
  func.func @transform_5(%arg0: i32) -> (i32, i32) {
    %c0_i32 = arith.constant 0 : i32
    %c0_i32_0 = arith.constant 0 : i32
    %c0_i32_1 = arith.constant 0 : i32
    return %c0_i32, %c0_i32_0 : i32, i32
  }
  func.func @transform_6(%arg0: i32) -> (i32, i32) {
    %c0_i32 = arith.constant 0 : i32
    %c0_i32_0 = arith.constant 0 : i32
    %c0_i32_1 = arith.constant 0 : i32
    return %c0_i32, %c0_i32_0 : i32, i32
  }
  func.func @transform_7(%arg0: i32) -> (i32, i32) {
    %c0_i32 = arith.constant 0 : i32
    %c0_i32_0 = arith.constant 0 : i32
    %c0_i32_1 = arith.constant 0 : i32
    return %c0_i32, %c0_i32_0 : i32, i32
  }
  func.func @transform_8(%arg0: i32) -> (i32, i32) {
    %c0_i32 = arith.constant 0 : i32
    %c0_i32_0 = arith.constant 0 : i32
    %c0_i32_1 = arith.constant 0 : i32
    return %c0_i32, %c0_i32_0 : i32, i32
  }
  func.func @transform_9(%arg0: i32) -> (i32, i32, i32) {
    %c0_i32 = arith.constant 0 : i32
    %c0_i32_0 = arith.constant 0 : i32
    %c0_i32_1 = arith.constant 0 : i32
    return %arg0, %c0_i32, %c0_i32_0 : i32, i32, i32
  }
}

</mosaic_0001>

<bundles_post_ra>
// kernel: tpu_custom_call.1
= control target key start
LH: loop header
LB: loop body
LE: loop exit
PB: predicated region body
PF: predicated region fallthrough
CT: control target
= control target key end

     0   :  { %s3588_s0 = inlined_call_operand.hbm [shape: bf16[2,128,128], index: 0, kind: input, shape index: {}]   ;;  %s3589_s1 = inlined_call_operand.hbm [shape: f32[2,128,128], index: 1, kind: input, shape index: {}]   ;;  %s3590_s2 = inlined_call_operand.hbm [shape: bf16[128,128], index: 2, kind: input, shape index: {}]   ;;  %s3591_s3 = inlined_call_operand.hbm [shape: f32[5,128], index: 3, kind: input, shape index: {}]   ;;  %s3592_s4 = inlined_call_operand.hbm [shape: bf16[128,128], index: 4, kind: input, shape index: {}]   ;;  %s3593_s5 = inlined_call_operand.vmem [shape: f32[5,128], index: 5, kind: input, shape index: {}]   ;;  %s3594_s6 = inlined_call_operand.hbm [shape: bf16[128,128], index: 6, kind: input, shape index: {}]   ;;  %s3595_s7 = inlined_call_operand.hbm [shape: f32[5,128], index: 7, kind: input, shape index: {}]   ;;  %s3596_s8 = inlined_call_operand.vmem [shape: f32[2,128], index: 8, kind: input, shape index: {}]   ;;  %s3597_s9 = inlined_call_operand.hbm [shape: f32[2,128,128], index: 9, kind: output, shape index: {}]  }
   0x1   :  { %3603 = sst [smem:[#allocation22_spill]] %s3588_s0 }
   0x2   :  { %3604 = sst [smem:[#allocation23_spill]] %s3590_s2 }
   0x3   :  { %3605 = sst [smem:[#allocation24_spill]] %s3591_s3 }
   0x4   :  { %3606 = sst [smem:[#allocation25_spill]] %s3592_s4 }
   0x5   :  { %3607 = sst [smem:[#allocation26_spill]] %s3594_s6 }
   0x6   :  { %3608 = sst [smem:[#allocation27_spill]] %s3595_s7 }
   0x7   :  { %14 = vsyncpa [#allocation3], 0 }
   0x8   :  { %16 = vsyncpa [#allocation3 + $0x1], 0 }
   0x9   :  { %17 = vsyncpa [#allocation6], 0 }
   0xa   :  { %19 = vsyncpa [#allocation6 + $0x1], 0 }
   0xb   :  { %20 = vsyncpa [#allocation9], 0 }
   0xc   :  { %21 = vsyncpa [#allocation12], 0 }
   0xd   :  { %22 = vsyncpa [#allocation4], 0 }
   0xe   :  { %24 = vsyncpa [#allocation4 + $0x1], 0  ;;  %s2936_s30 = smov 0   ;;  %s2938_s10 = smov 0  }
   0xf   :  { %s2940_s11 = smov 0   ;;  %s2942_s12 = smov 0  }
  0x10 LB: > { %s2871_s13 = smov [#allocation7]   ;;  %s2957_s15 = sadd.s32 4294967295, %s2869_s12   ;;  %s2869_s12 = sphi %s2942_s12, %s3641_s12   ;;  %s2865_s11 = sphi %s2940_s11, %s3640_s11   ;;  %s2861_s10 = sphi %s2938_s10, %s3639_s10   ;;  %s2857_s30 = sphi %s2936_s30, %s3638_s30  }
  0x11   : > { %s272_s14 = sshll.u32 %s2871_s13, 4  ;;  %p2033_p0 = scmp.ge.s32.totalorder %s2869_s12, 1  ;;  %s273_s14 = int_to_ptr.vmem [resolvable:$true] %s272_s14 }
  0x12   : > { %p3600_p1 = scmp.eq.s32.totalorder %s2957_s15, 0  ;;  %p260_p2 = scmp.lt.s32.totalorder %s2869_s12, 3 }
  0x13   : > { %s2872_s17 = smov [#allocation8]   ;;  %s2873_s20 = smov [#allocation11]  }
  0x14   : > { %p2962_p3 = pnand %p2033_p0, %p260_p2  ;;  %s286_s18 = sshll.u32 %s2872_s17, 4  ;;  %s287_s18 = int_to_ptr.vmem [resolvable:$true] %s286_s18 }
  0x15   : > { %s312_s21 = sshll.u32 %s2873_s20, 4  ;;  %s2614_s23 = scalar_lea.vmem %s273_s14, 1024  ;;  %s2975_s21 = int_to_ptr.vmem [resolvable:$true] %s312_s21 }
  0x16   : > { %p2422_p5 = pneg %p2962_p3  ;;  %p2615_p8 = scmp.ne.s32.totalorder %s273_s14, %s2614_s23 }
  0x17   : > { %p2622_p11 = scmp.lt.s32.totalorder %s273_s14, %s273_s14  ;;  %p2623_p12 = scmp.lt.s32.totalorder %s2614_s23, %s2614_s23 }
  0x18   : > { %p2971_p6 = pnand %p2422_p5, %p3600_p1 }
  0x19   : > { %p2624_p13 = por %p2623_p12, %p2622_p11 }
  0x1a   : > { %p2979_p7 = pneg %p2971_p6 }
  0x1c   : > { %p2617_p9 = pnand %p2615_p8, %p2979_p7 }
  0x1e   : > { %p2618_p10 = pneg %p2617_p9 }
  0x20   : > { %p2625_p0 = pnand %p2624_p13, %p2618_p10 }
  0x22   : > { %2628 = shalt.err (!%p2625_p0)
}
  0x23   : > { %s3598_s24 = smov 64   ;;  %s3599_s25 = smov 4  }
  0x24   : > { %s3612_s2 = sld [smem:[#allocation23_spill]]  ;;  %s2640_s28 = scalar_lea.vmem %s287_s18, 128 }
  0x25   : > { %p2641_p2 = scmp.ne.s32.totalorder %s287_s18, %s2640_s28  ;;  %p2648_p9 = scmp.lt.s32.totalorder %s287_s18, %s287_s18 }
  0x26   : > { %p2649_p10 = scmp.lt.s32.totalorder %s2640_s28, %s2640_s28 }
  0x27   : > { %p2643_p5 = pnand %p2641_p2, %p2979_p7 }
  0x28   : > { %p2650_p11 = por %p2649_p10, %p2648_p9 }
  0x29   : > { %p2644_p8 = pneg %p2643_p5 }
  0x2a   : > { %2425 = dma.hbm_to_vmem [thread:$0]  (!%p2971_p6), %s3612_s2, 1024, %s273_s14, [#allocation6], %s3598_s24, %s3598_s24, %s3599_s25  }
  0x2b   : > { %p2651_p12 = pnand %p2650_p11, %p2644_p8 }
  0x2d   : > { %2654 = shalt.err (!%p2651_p12)
}
  0x2e   : > { %s3613_s3 = sld [smem:[#allocation24_spill]]  ;;  %s2666_s14 = scalar_lea.vmem %s2975_s21, 1024 }
  0x2f   : > { %p2667_p13 = scmp.ne.s32.totalorder %s2975_s21, %s2666_s14  ;;  %p2674_p5 = scmp.lt.s32.totalorder %s2975_s21, %s2975_s21 }
  0x30   : > { %p2675_p9 = scmp.lt.s32.totalorder %s2666_s14, %s2666_s14 }
  0x31   : > { %p2669_p0 = pnand %p2667_p13, %p2979_p7 }
  0x32   : > { %p2676_p8 = por %p2675_p9, %p2674_p5 }
  0x33   : > { %p2670_p2 = pneg %p2669_p0 }
  0x34   : > { %2428 = dma.hbm_to_vmem [thread:$0]  (!%p2971_p6), %s3613_s3, 128, %s287_s18, [#allocation9]  }
  0x35   : > { %p2677_p10 = pnand %p2676_p8, %p2670_p2 }
  0x37   : > { %2680 = shalt.err (!%p2677_p10)
}
  0x38   : > { %s3614_s6 = sld [smem:[#allocation26_spill]]  ;;  %s2876_s18 = smov [#allocation10]  }
  0x39   : > { %s296_s23 = sshll.u32 %s2876_s18, 4  ;;  %s2877_s26 = smov [#allocation13]   ;;  %s297_s23 = int_to_ptr.vmem [resolvable:$true] %s296_s23 }
  0x3a   : > { %s326_s27 = sshll.u32 %s2877_s26, 4  ;;  %s2692_s28 = scalar_lea.vmem %s297_s23, 1024  ;;  %s327_s27 = int_to_ptr.vmem [resolvable:$true] %s326_s27 }
  0x3b   : > { %p2693_p11 = scmp.ne.s32.totalorder %s297_s23, %s2692_s28  ;;  %p2700_p0 = scmp.lt.s32.totalorder %s297_s23, %s297_s23 }
  0x3c   : > { %p2701_p2 = scmp.lt.s32.totalorder %s2692_s28, %s2692_s28 }
  0x3d   : > { %p2695_p12 = pnand %p2693_p11, %p2979_p7 }
  0x3e   : > { %2434 = dma.hbm_to_vmem [thread:$0]  (!%p2971_p6), %s3614_s6, 1024, %s2975_s21, [#allocation12], %s3598_s24, %s3598_s24, %s3599_s25  }
  0x3f   : > { %p2696_p13 = pneg %p2695_p12  ;;  %p2702_p5 = por %p2701_p2, %p2700_p0 }
  0x41   : > { %p2703_p9 = pnand %p2702_p5, %p2696_p13 }
  0x43   : > { %2706 = shalt.err (!%p2703_p9)
}
  0x44   : > { %s3615_s4 = sld [smem:[#allocation25_spill]]  ;;  %s2718_s13 = scalar_lea.vmem %s327_s27, 128 }
  0x45   : > { %p2719_p8 = scmp.ne.s32.totalorder %s327_s27, %s2718_s13  ;;  %p2726_p12 = scmp.lt.s32.totalorder %s327_s27, %s327_s27 }
  0x46   : > { %p2727_p0 = scmp.lt.s32.totalorder %s2718_s13, %s2718_s13 }
  0x47   : > { %p2721_p10 = pnand %p2719_p8, %p2979_p7 }
  0x48   : > { %p2728_p13 = por %p2727_p0, %p2726_p12 }
  0x49   : > { %p2722_p11 = pneg %p2721_p10 }
  0x4a   : > { %2431 = dma.hbm_to_vmem [thread:$0]  (!%p2971_p6), %s3615_s4, 1024, %s297_s23, [#allocation9], %s3598_s24, %s3598_s24, %s3599_s25  }
  0x4b   : > { %p2729_p2 = pnand %p2728_p13, %p2722_p11 }
  0x4d   : > { %2732 = shalt.err (!%p2729_p2)
}
  0x4e   : > { %s3616_s7 = sld [smem:[#allocation27_spill]]  ;;  %s2032_s22 = sadd.s32 4294967294, %s2869_s12  }
  0x4f   : > { %s3034_s19 = sadd.s32 1, %s2869_s12   ;;  %s37_s20 = sadd.s32 1, %s2865_s11 }
  0x50   : > { %s34_s18 = ssub.s32 %s2869_s12, %s3034_s19  ;;  %p44_p7 = scmp.ne.s32.totalorder %s2865_s11, %s2861_s10 }
  0x51   : > { %p35_p5 = scmp.eq.s32.totalorder %s34_s18, 0  ;;  %p45_p9 = scmp.eq.s32.totalorder %s2869_s12, 0 }
  0x52   : > { %p50_p8 = scmp.ne.s32.totalorder %s2861_s10, %s2857_s30  ;;  %p247_p10 = scmp.eq.s32.totalorder %s2957_s15, 1 }
  0x53   : > { %s3046_s23 = scalar_select %p35_p5, %s2865_s11, %s37_s20  }
  0x54   : > { %2437 = dma.hbm_to_vmem [thread:$0]  (!%p2971_p6), %s3616_s7, 128, %s327_s27, [#allocation12]  }
  0x55   : > { %3617 = sst [smem:[#allocation21_spill]] %s3046_s23  ;;  %p46_p11 = por %p45_p9, %p44_p7 }
  0x56   : > { %p3050_p12 = por %p3600_p1, %p50_p8  ;;  %p3054_p6 = por %p247_p10, %p44_p7 }
  0x57   : > { %p253_p0 = scmp.eq.s32.totalorder %s2032_s22, 1  ;;  %p2454_p13 = scmp.lt.s32.totalorder %s2869_s12, 2 }
  0x58   : > { %s3618_s26 = scalar_select %p3050_p12, 1, 0 }
  0x59   : > { %s3619_s27 = scalar_select %p3054_p6, 1, 0 }
  0x5a   : > { %s3060_s28 = sand.u32 1, %s2865_s11   ;;  %p3062_p2 = por %p253_p0, %p50_p8 }
  0x5b   : > { %s2040_s29 = sshll.u32 %s3060_s28, 6  ;;  %s2105_s13 = sshll.u32 %s2869_s12, 10 }
  0x5c   : > { %s3620_s21 = scalar_select %p3062_p2, 1, 0 }
  0x5d   : > { %s3621_s0 = sld [smem:[#allocation22_spill]]  ;;  %s344_s22 = scalar_lea.vmem [#allocation2], %s2040_s29 }
  0x5e   : > { %s351_s18 = sshll.u32 %s344_s22, 4  ;;  %p3073_p7 = pnand %p2454_p13, %p46_p11  ;;  %s3077_s18 = int_to_ptr.vmem [resolvable:$true] %s351_s18 }
  0x60   : > { %p2735_p9 = pneg %p3073_p7 }
  0x63   : > { %s3071_s20 = scalar_lea.hbm %s3621_s0, %s2105_s13  ;;  %s2738_s14 = scalar_lea.hbm %s3621_s0, 2048 }
  0x64   : > { %s2733_s3 = scalar_lea.hbm %s3071_s20, 1024  ;;  %p2739_p11 = scmp.lt.s32.totalorder %s3071_s20, %s3621_s0 }
  0x65   : > { %p2734_p5 = scmp.ne.s32.totalorder %s3071_s20, %s2733_s3  ;;  %p2740_p0 = scmp.lt.s32.totalorder %s2738_s14, %s2733_s3 }
  0x67   : > { %p2736_p8 = pnand %p2735_p9, %p2734_p5  ;;  %p2741_p13 = por %p2740_p0, %p2739_p11 }
  0x69   : > { %p2737_p10 = pneg %p2736_p8 }
  0x6b   : > { %p2742_p4 = pnand %p2741_p13, %p2737_p10 }
  0x6d   : > { %2745 = shalt.err (!%p2742_p4)
}
  0x6e   : > { %s2746_s25 = scalar_lea.vmem %s3077_s18, 1024  ;;  %s2878_s29 = smov [#allocation2]  }
  0x6f   : > { %p2747_p1 = scmp.ne.s32.totalorder %s3077_s18, %s2746_s25  ;;  %s2751_s13 = sshll.u32 %s2878_s29, 4  ;;  %s2752_s13 = int_to_ptr.vmem [resolvable:$false] %s2751_s13 }
  0x70   : > { %s2753_s2 = scalar_lea.vmem %s2752_s13, 2048  ;;  %p2754_p2 = scmp.lt.s32.totalorder %s3077_s18, %s2752_s13 }
  0x71   : > { %p2749_p5 = pnand %p2747_p1, %p2735_p9  ;;  %p2755_p6 = scmp.lt.s32.totalorder %s2753_s2, %s2746_s25 }
  0x73   : > { %p2750_p8 = pneg %p2749_p5  ;;  %p2756_p12 = por %p2755_p6, %p2754_p2 }
  0x75   : > { %p2757_p11 = pnand %p2756_p12, %p2750_p8 }
  0x77   : > { %2760 = shalt.err (!%p2757_p11)
}
  0x78   : > { %s3623_s3 = smov 4   ;;  %s3624_s14 = smov 64  }
  0x79   : > { %s3625_s17 = scalar_lea.sflag [#allocation3], %s3060_s28  ;;  %s2043_s22 = sshll.u32 %s3060_s28, 7 }
  0x7a   : > { %2441 = dma.hbm_to_vmem [thread:$0]  (!%p3073_p7), %s3071_s20, 1024, %s3077_s18, %s3625_s17, %s3624_s14, %s3624_s14, %s3623_s3  }
  0x7b   : > { %s2106_s29 = sshll.u32 %s2869_s12, 11  ;;  %s365_s0 = scalar_lea.vmem [#allocation5], %s2043_s22 }
  0x7c   : > { %s3115_s13 = scalar_lea.hbm %s3589_s1, %s2106_s29  ;;  %s372_s4 = sshll.u32 %s365_s0, 4  ;;  %s3117_s4 = int_to_ptr.vmem [resolvable:$true] %s372_s4 }
  0x7d   : > { %s3626_s6 = sand.u32 1, %s2869_s12   ;;  %s2761_s23 = scalar_lea.hbm %s3115_s13, 2048 }
  0x7e   : > { %s3121_s7 = scalar_lea.sflag [#allocation6], %s3626_s6  ;;  %p2762_p1 = scmp.ne.s32.totalorder %s3115_s13, %s2761_s23 }
  0x7f   : > { %s2766_s18 = scalar_lea.hbm %s3589_s1, 4096  ;;  %p2767_p6 = scmp.lt.s32.totalorder %s3115_s13, %s3589_s1 }
  0x80   : > { %p2764_p4 = pnand %p2762_p1, %p2735_p9  ;;  %p2768_p2 = scmp.lt.s32.totalorder %s2766_s18, %s2761_s23 }
  0x82   : > { %p2765_p12 = pneg %p2764_p4  ;;  %p2769_p10 = por %p2768_p2, %p2767_p6 }
  0x84   : > { %p2770_p0 = pnand %p2769_p10, %p2765_p12 }
  0x86   : > { %2773 = shalt.err (!%p2770_p0)
}
  0x87   : > { %s2774_s0 = scalar_lea.vmem %s3117_s4, 2048  ;;  %s2879_s6 = smov [#allocation5]  }
  0x88   : > { %p2775_p13 = scmp.ne.s32.totalorder %s3117_s4, %s2774_s0  ;;  %s2779_s17 = sshll.u32 %s2879_s6, 4  ;;  %s2780_s17 = int_to_ptr.vmem [resolvable:$false] %s2779_s17 }
  0x89   : > { %s2781_s22 = scalar_lea.vmem %s2780_s17, 4096  ;;  %p2782_p11 = scmp.lt.s32.totalorder %s3117_s4, %s2780_s17 }
  0x8a   : > { %p2777_p5 = pnand %p2775_p13, %p2735_p9  ;;  %p2783_p1 = scmp.lt.s32.totalorder %s2781_s22, %s2774_s0 }
  0x8c   : > { %p2778_p8 = pneg %p2777_p5  ;;  %p2784_p4 = por %p2783_p1, %p2782_p11 }
  0x8e   : > { %p2785_p6 = pnand %p2784_p4, %p2778_p8 }
  0x90   : > { %2788 = shalt.err (!%p2785_p6)
}
  0x91   : > { %s2880_s23 = smov 128   ;;  %s2881_s29 = smov 8  }
  0x92   : > { %2444 = dma.hbm_to_vmem [thread:$0]  (!%p3073_p7), %s3115_s13, 2048, %s3117_s4, %s3121_s7, %s2880_s23, %s2880_s23, %s2881_s29  }
  0x93   : > { %384 = sbr.rel (%p2962_p3) target bundleno = 1896 (0x768), region = 56  ;;  %s3149_s2 = sand.u32 (!%p2962_p3), 1, %s2861_s10  }
  0x94   : > { %s2047_s25 = sshll.u32 (!%p2962_p3), %s3149_s2, 6  ;;  %s387_s28 = scalar_lea.sflag (!%p2962_p3), [#allocation3], %s3149_s2 }
  0x95   : > { %s3153_s20 = scalar_lea.vmem (!%p2962_p3), [#allocation2], %s2047_s25  ;;  %p3627_p9 = scmp.ne.s32.totalorder (!%p2962_p3), %s3618_s26, 0 }
  0x98   : > { %2832 = dma.done.wait (%p3627_p9), %s387_s28, 1024  }
  0x99   : > { %2834 = vsyncadd (%p3627_p9), %s387_s28, 4294966272  ;;  %s395_s4 = sand.u32 1, %s2957_s15   ;;  %s2048_s7 = sshll.u32 %s3149_s2, 7 }
  0x9a   : > { %s396_s16 = scalar_lea.sflag [#allocation6], %s395_s4  ;;  %s3163_s24 = scalar_lea.vmem [#allocation5], %s2048_s7 }
  0x9b   : > { %2836 = dma.done.wait (%p3627_p9), %s396_s16, 2048  }
  0x9c   : > { %2838 = vsyncadd (%p3627_p9), %s396_s16, 4294965248  ;;  %p3628_p3 = scmp.eq.s32.totalorder %s2957_s15, 0 }
  0x9e   : > { %2840 = dma.done.wait (%p3628_p3), [#allocation6], 1024   ;;  %p3629_p7 = pmov %p3628_p3 }
  0x9f   : > { %p3630_p12 = pmov %p3628_p3 }
  0xa0   : > { %2842 = vsyncadd (%p3629_p7), [#allocation6], 4294966272 }
  0xa1   : > { %2844 = dma.done.wait (%p3630_p12), [#allocation9], 1152   ;;  %p3631_p2 = pmov %p3628_p3 }
  0xa3   : > { %2846 = vsyncadd (%p3631_p2), [#allocation9], 4294966144  ;;  %p3632_p10 = pmov %p3631_p2 }
  0xa4   : > { %p3633_p0 = pmov %p3631_p2 }
  0xa5   : > { %2848 = dma.done.wait (%p3632_p10), [#allocation12], 1152  }
  0xa6   : > { %2850 = vsyncadd (%p3633_p0), [#allocation12], 4294966144  ;;  %v474_v0 = vld [vmem:[%s3163_s24 + $0x70] sm:$0xff]  ;;  %v475_v1 = vld [vmem:[%s3163_s24 + $0x78] sm:$0xff]  ;;  %s3520_s4 = scalar_lea.vmem [#allocation14], %s2048_s7  ;;  %s2107_s7 = sshll.u32 %s2957_s15, 11 }
  0xa7   : > { %v472_v2 = vld [vmem:[%s3163_s24 + $0x60] sm:$0xff]  ;;  %v499_v3 = vpack.c.bf16 %v475_v1, %v474_v0  ;;  %v473_v4 = vld [vmem:[%s3163_s24 + $0x68] sm:$0xff]  ;;  %v470_v6 = vld [vmem:[%s3163_s24 + $0x50] sm:$0xff]  ;;  %s1889_s16 = sshll.u32 %s3520_s4, 4  ;;  %s3542_s13 = scalar_lea.hbm %s3597_s9, %s2107_s7  ;;  %s3544_s16 = int_to_ptr.vmem [resolvable:$true] %s1889_s16 }
  0xa8   : > { %v498_v5 = vpack.c.bf16 %v473_v4, %v472_v2  ;;  %v471_v7 = vld [vmem:[%s3163_s24 + $0x58] sm:$0xff]  ;;  %v468_v8 = vld [vmem:[%s3163_s24 + $0x40] sm:$0xff]  ;;  %v469_v10 = vld [vmem:[%s3163_s24 + $0x48] sm:$0xff]  ;;  %s1876_s18 = scalar_lea.sflag [#allocation4], %s3149_s2  ;;  %s2789_s3 = scalar_lea.vmem %s3544_s16, 2048 }
  0xa9   : > { %2204 = vmatprep.subr.bf16.mxu0 %v499_v3  ;;  %v497_v9 = vpack.c.bf16 %v471_v7, %v470_v6  ;;  %v3190_v11 = vld [vmem:[%s3153_s20] sm:$0xff]   ;;  %v496_v12 = vpack.c.bf16 %v469_v10, %v468_v8  ;;  %v466_v13 = vld [vmem:[%s3163_s24 + $0x30] sm:$0xff]  ;;  %v467_v14 = vld [vmem:[%s3163_s24 + $0x38] sm:$0xff]  ;;  %p2790_p13 = scmp.ne.s32.totalorder %s3544_s16, %s2789_s3  ;;  %p3634_p5 = scmp.ne.s32.totalorder %s3619_s27, 0 }
  0xaa   : > { %2205 = vmatpush3.bf16.msra.mxu0 %v499_v3  ;;  %2220 = vmatprep.mubr.bf16.mxu0 %v3190_v11  ;;  %v464_v15 = vld [vmem:[%s3163_s24 + $0x20] sm:$0xff]  ;;  %v495_v16 = vpack.c.bf16 %v467_v14, %v466_v13  ;;  %v465_v17 = vld [vmem:[%s3163_s24 + $0x28] sm:$0xff]  ;;  %v2515_v18 = vld [vmem:[#allocation7 + $0x38] sm:$0xff]   ;;  %s2883_s15 = smov [#allocation14]  }
  0xab   : > { %2206 = vmatprep.subr.bf16.mxu0 %v498_v5  ;;  %v2516_v19 = vld [vmem:[#allocation7 + $0x30] sm:$0xff]   ;;  %2236 = vmatprep.subr.bf16.mxu1 %v2515_v18  ;;  %v494_v21 = vpack.c.bf16 %v465_v17, %v464_v15  ;;  %v463_v22 = vld [vmem:[%s3163_s24 + $0x18] sm:$0xff]  ;;  %v2517_v23 = vld [vmem:[#allocation7 + $0x28] sm:$0xff]   ;;  %p2791_p8 = pnand %p2790_p13, %p3634_p5  ;;  %s2793_s14 = sshll.u32 %s2883_s15, 4  ;;  %s2794_s14 = int_to_ptr.vmem [resolvable:$false] %s2793_s14 }
  0xac   : > { %v462_v20 = vld [vmem:[%s3163_s24 + $0x10] sm:$0xff]  ;;  %2237 = vmatpush3.bf16.msra.mxu1 %v2515_v18  ;;  %v460_v24 = vld [vmem:[%s3163_s24] sm:$0xff]  ;;  %v461_v25 = vld [vmem:[%s3163_s24 + $0x8] sm:$0xff]  ;;  %s2795_s0 = scalar_lea.vmem %s2794_s14, 4096  ;;  %p2796_p1 = scmp.lt.s32.totalorder %s3544_s16, %s2794_s14 }
  0xad   : > { %2238 = vmatprep.subr.bf16.mxu1 %v2516_v19  ;;  %v2518_v26 = vld [vmem:[#allocation7 + $0x20] sm:$0xff]   ;;  %v493_v27 = vpack.c.bf16 %v463_v22, %v462_v20  ;;  %v2519_v28 = vld [vmem:[#allocation7 + $0x18] sm:$0xff]   ;;  %v492_v29 = vpack.c.bf16 %v461_v25, %v460_v24  ;;  %v2520_v30 = vld [vmem:[#allocation7 + $0x10] sm:$0xff]   ;;  %p2792_p11 = pneg %p2791_p8  ;;  %p2797_p4 = scmp.lt.s32.totalorder %s2795_s0, %s2789_s3 }
  0xae   : > { %2207 = vmatpush3.bf16.msra.mxu0 %v498_v5  ;;  %v3202_v31 = vld [vmem:[%s3153_s20 + $0x8] sm:$0xff]   ;;  %v3205_v32 = vld [vmem:[%s3153_s20 + $0x10] sm:$0xff]   ;;  %v3210_v33 = vld [vmem:[%s3153_s20 + $0x18] sm:$0xff]  }
  0xaf   : > { %2208 = vmatprep.subr.bf16.mxu0 %v497_v9  ;;  %v3213_v34 = vld [vmem:[%s3153_s20 + $0x20] sm:$0xff]   ;;  %v3218_v35 = vld [vmem:[%s3153_s20 + $0x28] sm:$0xff]   ;;  %v3221_v36 = vld [vmem:[%s3153_s20 + $0x30] sm:$0xff]   ;;  %p2798_p6 = por %p2797_p4, %p2796_p1 }
  0xb0   : > { %2239 = vmatpush3.bf16.msra.mxu1 %v2516_v19  ;;  %v3226_v37 = vld [vmem:[%s3153_s20 + $0x38] sm:$0xff]   ;;  %v2521_v38 = vld [vmem:[#allocation7 + $0x8] sm:$0xff]   ;;  %v2522_v39 = vld [vmem:[#allocation7] sm:$0xff]  }
  0xb1   : > { %2240 = vmatprep.subr.bf16.mxu1 %v2517_v23  ;;  %v2523_v0 = vld [vmem:[#allocation10 + $0x38] sm:$0xff]   ;;  %v2524_v1 = vld [vmem:[#allocation10 + $0x30] sm:$0xff]   ;;  %v2525_v2 = vld [vmem:[#allocation10 + $0x28] sm:$0xff]   ;;  %p2799_p9 = pnand %p2798_p6, %p2792_p11 }
  0xb2   : > { %2209 = vmatpush3.bf16.msra.mxu0 %v497_v9  ;;  %v2526_v3 = vld [vmem:[#allocation10 + $0x20] sm:$0xff]   ;;  %v2527_v4 = vld [vmem:[#allocation10 + $0x18] sm:$0xff]   ;;  %v2528_v5 = vld [vmem:[#allocation10 + $0x10] sm:$0xff]  }
  0xb3   : > { %2210 = vmatprep.subr.bf16.mxu0 %v496_v12  ;;  %v3234_v18 = vld [vmem:[#allocation8] ss:$0 sm:$0xff] }
  0xb4   : > { %2241 = vmatpush3.bf16.msra.mxu1 %v2517_v23 }
  0xb5   : > { %2242 = vmatprep.subr.bf16.mxu1 %v2518_v26 }
  0xb6   : > { %2211 = vmatpush3.bf16.msra.mxu0 %v496_v12 }
  0xb7   : > { %2212 = vmatprep.subr.bf16.mxu0 %v495_v16 }
  0xb8   : > { %2243 = vmatpush3.bf16.msra.mxu1 %v2518_v26 }
  0xb9   : > { %2244 = vmatprep.subr.bf16.mxu1 %v2519_v28 }
  0xba   : > { %2213 = vmatpush3.bf16.msra.mxu0 %v495_v16 }
  0xbb   : > { %2214 = vmatprep.subr.bf16.mxu0 %v494_v21 }
  0xbc   : > { %2245 = vmatpush3.bf16.msra.mxu1 %v2519_v28 }
  0xbd   : > { %2246 = vmatprep.subr.bf16.mxu1 %v2520_v30 }
  0xbe   : > { %2215 = vmatpush3.bf16.msra.mxu0 %v494_v21 }
  0xbf   : > { %2216 = vmatprep.subr.bf16.mxu0 %v493_v27 }
  0xc0   : > { %2247 = vmatpush3.bf16.msra.mxu1 %v2520_v30 }
  0xc1   : > { %2248 = vmatprep.subr.bf16.mxu1 %v2521_v38 }
  0xc2   : > { %2217 = vmatpush3.bf16.msra.mxu0 %v493_v27 }
  0xc3   : > { %2218 = vmatprep.subr.bf16.mxu0 %v492_v29 }
  0xc4   : > { %2249 = vmatpush3.bf16.msra.mxu1 %v2521_v38 }
  0xc5   : > { %2250 = vmatprep.subr.bf16.mxu1 %v2522_v39 }
  0xc6   : > { %2219 = vmatpush3.bf16.msra.mxu0 %v492_v29  ;;  %v3241_v29 = vld [vmem:[#allocation8 + $0x1] ss:$0 sm:$0xff] }
  0xc8   : > { %2251 = vmatpush3.bf16.msra.mxu1 %v2522_v39 }
  0xc9   : > { %2221 = vmatmul.mubr.bf16.vlgmr.msra.gmra.mxu0 %v3202_v31  ;;  %2300 = vmatprep.subr.bf16.mxu1 %v2523_v0 }
  0xca   : > { %2224 = vmatprep.mubr.bf16.mxu0 %v3205_v32 }
  0xd1   : > { %2225 = vmatmul.mubr.bf16.gmra.mxu0 %v3210_v33 }
  0xd2   : > { %2228 = vmatprep.mubr.bf16.mxu0 %v3213_v34 }
  0xd9   : > { %2229 = vmatmul.mubr.bf16.gmra.mxu0 %v3218_v35 }
  0xda   : > { %2232 = vmatprep.mubr.bf16.mxu0 %v3221_v36 }
  0xe1   : > { %2233 = vmatmul.mubr.bf16.gmra.mxu0 %v3226_v37 }
  0xe2   : > { %2284 = vmatprep.mubr.bf16.mxu0 %v3190_v11 }
 0x189   : > { %v2222_v40 = vpop.f32.mrf.mxu0 }
 0x18b   : > { %v582_v41 = vpop.f32.mrf.mxu0 }
 0x18d   : > { %v2223_v42 = vpop.f32.mrf.mxu0 }
 0x18e   : > { %v646_v45 = vpack.c.bf16 %v2223_v42, %v2222_v40 }
 0x18f   : > { %v585_v43 = vpop.f32.mrf.mxu0 }
 0x190   : > { %v645_v44 = vpack.c.bf16 %v585_v43, %v582_v41 }
 0x191   : > { %v2226_v46 = vpop.f32.mrf.mxu0 }
 0x192   : > { %2252 = vmatprep.mubr.bf16.mxu1 %v645_v44 }
 0x193   : > { %v598_v47 = vpop.f32.mrf.mxu0  ;;  %2253 = vmatmul.mubr.bf16.vlgmr.msra.gmra.mxu1 %v646_v45 }
 0x194   : > { %2301 = vmatpush3.bf16.msra.mxu1 %v2523_v0 }
 0x195   : > { %v2227_v48 = vpop.f32.mrf.mxu0  ;;  %2302 = vmatprep.subr.bf16.mxu1 %v2524_v1 }
 0x196   : > { %v648_v51 = vpack.c.bf16 %v2227_v48, %v2226_v46 }
 0x197   : > { %v601_v49 = vpop.f32.mrf.mxu0 }
 0x198   : > { %v647_v50 = vpack.c.bf16 %v601_v49, %v598_v47  ;;  %2303 = vmatpush3.bf16.msra.mxu1 %v2524_v1  ;;  %v3251_v47 = vld [vmem:[#allocation8 + $0x2] ss:$0 sm:$0xff] }
 0x199   : > { %v2230_v52 = vpop.f32.mrf.mxu0  ;;  %2304 = vmatprep.subr.bf16.mxu1 %v2525_v2 }
 0x19a   : > { %2256 = vmatprep.mubr.bf16.mxu1 %v647_v50 }
 0x19b   : > { %v614_v53 = vpop.f32.mrf.mxu0  ;;  %2257 = vmatmul.mubr.bf16.gmra.mxu1 %v648_v51 }
 0x19c   : > { %2305 = vmatpush3.bf16.msra.mxu1 %v2525_v2 }
 0x19d   : > { %v2231_v54 = vpop.f32.mrf.mxu0  ;;  %2306 = vmatprep.subr.bf16.mxu1 %v2526_v3 }
 0x19e   : > { %v650_v57 = vpack.c.bf16 %v2231_v54, %v2230_v52 }
 0x19f   : > { %v617_v55 = vpop.f32.mrf.mxu0 }
 0x1a0   : > { %v649_v56 = vpack.c.bf16 %v617_v55, %v614_v53  ;;  %2307 = vmatpush3.bf16.msra.mxu1 %v2526_v3 }
 0x1a1   : > { %v2234_v58 = vpop.f32.mrf.mxu0  ;;  %2308 = vmatprep.subr.bf16.mxu1 %v2527_v4 }
 0x1a2   : > { %2260 = vmatprep.mubr.bf16.mxu1 %v649_v56 }
 0x1a3   : > { %v630_v59 = vpop.f32.mrf.mxu0  ;;  %2261 = vmatmul.mubr.bf16.gmra.mxu1 %v650_v57 }
 0x1a4   : > { %2309 = vmatpush3.bf16.msra.mxu1 %v2527_v4 }
 0x1a5   : > { %v2235_v60 = vpop.f32.mrf.mxu0  ;;  %2310 = vmatprep.subr.bf16.mxu1 %v2528_v5 }
 0x1a6   : > { %v652_v63 = vpack.c.bf16 %v2235_v60, %v2234_v58 }
 0x1a7   : > { %v633_v61 = vpop.f32.mrf.mxu0 }
 0x1a8   : > { %v651_v62 = vpack.c.bf16 %v633_v61, %v630_v59  ;;  %2311 = vmatpush3.bf16.msra.mxu1 %v2528_v5 }
 0x1aa   : > { %2264 = vmatprep.mubr.bf16.mxu1 %v651_v62 }
 0x1ab   : > { %2265 = vmatmul.mubr.bf16.gmra.mxu1 %v652_v63 }
 0x253   : > { %v2254_v6 = vpop.f32.mrf.mxu1 }
 0x254   : > { %v3249_v46 = vadd.f32 %v2254_v6, %v3234_v18 }
 0x255   : > { %v3230_v7 = vpop.f32.mrf.mxu1 }
 0x257   : > { %v2255_v8 = vpop.f32.mrf.mxu1 }
 0x258   : > { %v768_v0 = vadd.f32 %v2255_v8, %v3234_v18 }
 0x259   : > { %v3232_v9 = vpop.f32.mrf.mxu1 }
 0x25b   : > { %v2258_v10 = vpop.f32.mrf.mxu1 }
 0x25c   : > { %v781_v48 = vadd.f32 %v2258_v10, %v3234_v18 }
 0x25d   : > { %v772_v12 = vpop.f32.mrf.mxu1 }
 0x25e   : > { %v825_v1 = vmax.f32 %v781_v48, 0.0  ;;  %v773_v2 = vadd.f32 %v3234_v18, %v772_v12 }
 0x25f   : > { %v2259_v13 = vpop.f32.mrf.mxu1 }
 0x260   : > { %v784_v39 = vadd.f32 %v2259_v13, %v3234_v18  ;;  %v821_v13 = vmax.f32 %v3249_v46, 0.0  ;;  %v757_v46 = vadd.f32 %v3234_v18, %v3230_v7 }
 0x261   : > { %v775_v14 = vpop.f32.mrf.mxu1 }
 0x262   : > { %v826_v56 = vmax.f32 %v784_v39, 0.0  ;;  %v776_v57 = vadd.f32 %v3234_v18, %v775_v14  ;;  %v3270_v14 = vld [vmem:[#allocation8 + $0x3] ss:$0 sm:$0xff] }
 0x263   : > { %v2262_v15 = vpop.f32.mrf.mxu1 }
 0x264   : > { %v797_v19 = vadd.f32 %v2262_v15, %v3234_v18  ;;  %v847_v15 = vmul.f32 %v3241_v29, %v826_v56 }
 0x265   : > { %v788_v16 = vpop.f32.mrf.mxu1 }
 0x266   : > { %v829_v26 = vmax.f32 %v797_v19, 0.0  ;;  %v789_v27 = vadd.f32 %v3234_v18, %v788_v16  ;;  %v824_v16 = vmax.f32 %v776_v57, 0.0 }
 0x267   : > { %v2263_v17 = vpop.f32.mrf.mxu1 }
 0x268   : > { %v800_v20 = vadd.f32 %v2263_v17, %v3234_v18  ;;  %v850_v49 = vmul.f32 %v3241_v29, %v829_v26  ;;  %v827_v50 = vmax.f32 %v789_v27, 0.0  ;;  %v845_v39 = vmul.f32 %v3241_v29, %v824_v16 }
 0x269   : > { %v791_v21 = vpop.f32.mrf.mxu1 }
 0x26a   : > { %v830_v22 = vmax.f32 %v800_v20, 0.0  ;;  %v792_v23 = vadd.f32 %v3234_v18, %v791_v21  ;;  %v871_v3 = vadd.f32 %v3251_v47, %v850_v49  ;;  %v848_v4 = vmul.f32 %v3241_v29, %v827_v50 }
 0x26b   : > { %v2266_v24 = vpop.f32.mrf.mxu1  ;;  %v822_v21 = vmax.f32 %v768_v0, 0.0  ;;  %v866_v57 = vadd.f32 %v3251_v47, %v845_v39 }
 0x26c   : > { %v813_v25 = vadd.f32 %v2266_v24, %v3234_v18  ;;  %v851_v40 = vmul.f32 %v3241_v29, %v830_v22  ;;  %v828_v41 = vmax.f32 %v792_v23, 0.0  ;;  %v846_v22 = vmul.f32 %v3241_v29, %v825_v1 }
 0x26d   : > { %v804_v28 = vpop.f32.mrf.mxu1  ;;  %v823_v23 = vmax.f32 %v773_v2, 0.0  ;;  %v887_v24 = vmax.f32 %v871_v3, 0.0 }
 0x26e   : > { %v833_v30 = vmax.f32 %v813_v25, 0.0  ;;  %v805_v38 = vadd.f32 %v3234_v18, %v804_v28  ;;  %v872_v58 = vadd.f32 %v3251_v47, %v851_v40  ;;  %v849_v59 = vmul.f32 %v3241_v29, %v828_v41  ;;  %v3285_v41 = vld [vmem:[#allocation8 + $0x4] ss:$0 sm:$0xff] }
 0x26f   : > { %v2267_v42 = vpop.f32.mrf.mxu1  ;;  %v869_v25 = vadd.f32 %v3251_v47, %v848_v4  ;;  %v844_v48 = vmul.f32 %v3241_v29, %v823_v23  ;;  %v908_v49 = vmul.f32 %v3270_v14, %v887_v24  ;;  %v882_v4 = vmax.f32 %v866_v57, 0.0 }
 0x270   : > { %v854_v43 = vmul.f32 %v3241_v29, %v833_v30  ;;  %v831_v44 = vmax.f32 %v805_v38, 0.0  ;;  %v816_v45 = vadd.f32 %v2267_v42, %v3234_v18  ;;  %v888_v8 = vmax.f32 %v872_v58, 0.0 }
 0x271   : > { %v807_v51 = vpop.f32.mrf.mxu1  ;;  %v870_v17 = vadd.f32 %v3251_v47, %v849_v59  ;;  %v760_v30 = vadd.f32 %v3234_v18, %v3232_v9  ;;  %v868_v38 = vadd.f32 %v3251_v47, %v847_v15  ;;  %v867_v9 = vadd.f32 %v3251_v47, %v846_v22 }
 0x272   : > { %v875_v52 = vadd.f32 %v3251_v47, %v854_v43  ;;  %v852_v53 = vmul.f32 %v3241_v29, %v831_v44  ;;  %v834_v54 = vmax.f32 %v816_v45, 0.0  ;;  %v808_v55 = vadd.f32 %v3234_v18, %v807_v51 }
 0x273   : > { %v909_v40 = vmul.f32 %v3270_v14, %v888_v8  ;;  %v886_v42 = vmax.f32 %v870_v17, 0.0  ;;  %v885_v50 = vmax.f32 %v869_v25, 0.0  ;;  %v884_v56 = vmax.f32 %v868_v38, 0.0 }
 0x274   : > { %v891_v60 = vmax.f32 %v875_v52, 0.0  ;;  %v873_v61 = vadd.f32 %v3251_v47, %v852_v53  ;;  %v855_v62 = vmul.f32 %v3241_v29, %v834_v54  ;;  %v832_v63 = vmax.f32 %v808_v55, 0.0 }
 0x275   : > { %v843_v54 = vmul.f32 %v3241_v29, %v822_v21  ;;  %v820_v55 = vmax.f32 %v760_v30, 0.0  ;;  %v907_v7 = vmul.f32 %v3270_v14, %v886_v42  ;;  %v930_v58 = vadd.f32 %v3285_v41, %v909_v40 }
 0x276   : > { %v889_v5 = vmax.f32 %v873_v61, 0.0  ;;  %v876_v6 = vadd.f32 %v3251_v47, %v855_v62  ;;  %v853_v10 = vmul.f32 %v3241_v29, %v832_v63  ;;  %v912_v12 = vmul.f32 %v3270_v14, %v891_v60 }
 0x277   : > { %v842_v59 = vmul.f32 %v3241_v29, %v821_v13  ;;  %v819_v60 = vmax.f32 %v757_v46, 0.0  ;;  %v883_v61 = vmax.f32 %v867_v9, 0.0  ;;  %v865_v62 = vadd.f32 %v3251_v47, %v844_v48 }
 0x278   : > { %v892_v19 = vmax.f32 %v876_v6, 0.0  ;;  %v874_v20 = vadd.f32 %v3251_v47, %v853_v10  ;;  %v910_v26 = vmul.f32 %v3270_v14, %v889_v5  ;;  %v933_v44 = vadd.f32 %v3285_v41, %v912_v12 }
 0x279   : > { %v906_v63 = vmul.f32 %v3270_v14, %v885_v50  ;;  %v929_v0 = vadd.f32 %v3285_v41, %v908_v49  ;;  %v864_v1 = vadd.f32 %v3251_v47, %v843_v54  ;;  %v841_v2 = vmul.f32 %v3241_v29, %v820_v55 }
 0x27a   : > { %v913_v27 = vmul.f32 %v3270_v14, %v892_v19  ;;  %v890_v28 = vmax.f32 %v874_v20, 0.0  ;;  %v931_v52 = vadd.f32 %v3285_v41, %v910_v26  ;;  %v905_v3 = vmul.f32 %v3270_v14, %v884_v56 }
 0x27b   : > { %v940_v5 = vpack.c.bf16 %v930_v58, %v929_v0  ;;  %v928_v6 = vadd.f32 %v3285_v41, %v907_v7  ;;  %v863_v10 = vadd.f32 %v3251_v47, %v842_v59  ;;  %v840_v13 = vmul.f32 %v3241_v29, %v819_v60 }
 0x27c   : > { %v911_v43 = vmul.f32 %v3270_v14, %v890_v28  ;;  %v934_v45 = vadd.f32 %v3285_v41, %v913_v27  ;;  %v904_v15 = vmul.f32 %v3270_v14, %v883_v61  ;;  %v881_v16 = vmax.f32 %v865_v62, 0.0 }
 0x27d   : > { %v927_v8 = vadd.f32 %v3285_v41, %v906_v63  ;;  %v880_v17 = vmax.f32 %v864_v1, 0.0  ;;  %v862_v12 = vadd.f32 %v3251_v47, %v841_v2  ;;  %v903_v19 = vmul.f32 %v3270_v14, %v882_v4 }
 0x27e   : > { %v942_v51 = vpack.c.bf16 %v934_v45, %v933_v44  ;;  %v932_v53 = vadd.f32 %v3285_v41, %v911_v43  ;;  %v926_v21 = vadd.f32 %v3285_v41, %v905_v3  ;;  %v879_v22 = vmax.f32 %v863_v10, 0.0  ;;  %v2532_v10 = vld [vmem:[#allocation11 + $0x30] sm:$0xff]  }
 0x27f   : > { %v939_v20 = vpack.c.bf16 %v928_v6, %v927_v8  ;;  %v861_v23 = vadd.f32 %v3251_v47, %v840_v13  ;;  %v902_v29 = vmul.f32 %v3270_v14, %v881_v16  ;;  %v925_v24 = vadd.f32 %v3285_v41, %v904_v15  ;;  %v2531_v6 = vld [vmem:[#allocation11 + $0x38] sm:$0xff]   ;;  %v2533_v13 = vld [vmem:[#allocation11 + $0x28] sm:$0xff]   ;;  %v2534_v15 = vld [vmem:[#allocation11 + $0x20] sm:$0xff]  }
 0x280   : > { %2268 = vmatprep.subr.bf16.mxu0 %v942_v51  ;;  %v941_v18 = vpack.c.bf16 %v932_v53, %v931_v52  ;;  %v901_v25 = vmul.f32 %v3270_v14, %v880_v17  ;;  %v878_v26 = vmax.f32 %v862_v12, 0.0  ;;  %v924_v28 = vadd.f32 %v3285_v41, %v903_v19  ;;  %v2535_v16 = vld [vmem:[#allocation11 + $0x18] sm:$0xff]   ;;  %v2536_v8 = vld [vmem:[#allocation11 + $0x10] sm:$0xff]  }
 0x281   : > { %2269 = vmatpush3.bf16.msra.mxu0 %v942_v51  ;;  %v938_v27 = vpack.c.bf16 %v926_v21, %v925_v24  ;;  %v900_v30 = vmul.f32 %v3270_v14, %v879_v22  ;;  %v877_v38 = vmax.f32 %v861_v23, 0.0  ;;  %v923_v39 = vadd.f32 %v3285_v41, %v902_v29 }
 0x282   : > { %2270 = vmatprep.subr.bf16.mxu0 %v941_v18  ;;  %v899_v47 = vmul.f32 %v3270_v14, %v878_v26  ;;  %v922_v42 = vadd.f32 %v3285_v41, %v901_v25 }
 0x283   : > { %v937_v40 = vpack.c.bf16 %v924_v28, %v923_v39  ;;  %v898_v43 = vmul.f32 %v3270_v14, %v877_v38  ;;  %v921_v44 = vadd.f32 %v3285_v41, %v900_v30  ;;  %v2529_v14 = vld [vmem:[#allocation10 + $0x8] sm:$0xff]  }
 0x284   : > { %v920_v46 = vadd.f32 %v3285_v41, %v899_v47  ;;  %2312 = vmatprep.subr.bf16.mxu1 %v2529_v14 }
 0x285   : > { %2271 = vmatpush3.bf16.msra.mxu0 %v941_v18  ;;  %v936_v45 = vpack.c.bf16 %v922_v42, %v921_v44  ;;  %v919_v9 = vadd.f32 %v3285_v41, %v898_v43  ;;  %2313 = vmatpush3.bf16.msra.mxu1 %v2529_v14  ;;  %v2530_v41 = vld [vmem:[#allocation10] sm:$0xff]  }
 0x286   : > { %2272 = vmatprep.subr.bf16.mxu0 %v940_v5  ;;  %2314 = vmatprep.subr.bf16.mxu1 %v2530_v41 }
 0x287   : > { %v935_v48 = vpack.c.bf16 %v920_v46, %v919_v9  ;;  %v3354_v46 = vld [vmem:[%s3593_s5 + $0x1] ss:$0 sm:$0xff] }
 0x289   : > { %2273 = vmatpush3.bf16.msra.mxu0 %v940_v5  ;;  %2315 = vmatpush3.bf16.msra.mxu1 %v2530_v41 }
 0x28a   : > { %2274 = vmatprep.subr.bf16.mxu0 %v939_v20  ;;  %2364 = vmatprep.subr.bf16.mxu1 %v2531_v6 }
 0x28d   : > { %2275 = vmatpush3.bf16.msra.mxu0 %v939_v20 }
 0x28e   : > { %2276 = vmatprep.subr.bf16.mxu0 %v938_v27 }
 0x291   : > { %2277 = vmatpush3.bf16.msra.mxu0 %v938_v27  ;;  %v3344_v27 = vld [vmem:[%s3593_s5] ss:$0 sm:$0xff] }
 0x292   : > { %2278 = vmatprep.subr.bf16.mxu0 %v937_v40 }
 0x295   : > { %2279 = vmatpush3.bf16.msra.mxu0 %v937_v40 }
 0x296   : > { %2280 = vmatprep.subr.bf16.mxu0 %v936_v45 }
 0x299   : > { %2281 = vmatpush3.bf16.msra.mxu0 %v936_v45 }
 0x29a   : > { %2282 = vmatprep.subr.bf16.mxu0 %v935_v48 }
 0x29d   : > { %2283 = vmatpush3.bf16.msra.mxu0 %v935_v48 }
 0x2a0   : > { %2285 = vmatmul.mubr.bf16.vlgmr.msra.gmra.mxu0 %v3202_v31 }
 0x2a1   : > { %2288 = vmatprep.mubr.bf16.mxu0 %v3205_v32 }
 0x2a8   : > { %2289 = vmatmul.mubr.bf16.gmra.mxu0 %v3210_v33 }
 0x2a9   : > { %2292 = vmatprep.mubr.bf16.mxu0 %v3213_v34 }
 0x2b0   : > { %2293 = vmatmul.mubr.bf16.gmra.mxu0 %v3218_v35 }
 0x2b1   : > { %2296 = vmatprep.mubr.bf16.mxu0 %v3221_v36 }
 0x2b8   : > { %2297 = vmatmul.mubr.bf16.gmra.mxu0 %v3226_v37 }
 0x2b9   : > { %2348 = vmatprep.mubr.bf16.mxu0 %v3190_v11 }
 0x360   : > { %v2286_v49 = vpop.f32.mrf.mxu0 }
 0x362   : > { %v977_v50 = vpop.f32.mrf.mxu0 }
 0x364   : > { %v2287_v51 = vpop.f32.mrf.mxu0 }
 0x365   : > { %v1041_v54 = vpack.c.bf16 %v2287_v51, %v2286_v49 }
 0x366   : > { %v980_v52 = vpop.f32.mrf.mxu0 }
 0x367   : > { %v1040_v53 = vpack.c.bf16 %v980_v52, %v977_v50 }
 0x368   : > { %v2290_v55 = vpop.f32.mrf.mxu0 }
 0x369   : > { %2316 = vmatprep.mubr.bf16.mxu1 %v1040_v53 }
 0x36a   : > { %v993_v56 = vpop.f32.mrf.mxu0  ;;  %2317 = vmatmul.mubr.bf16.vlgmr.msra.gmra.mxu1 %v1041_v54 }
 0x36b   : > { %2365 = vmatpush3.bf16.msra.mxu1 %v2531_v6 }
 0x36c   : > { %v2291_v57 = vpop.f32.mrf.mxu0  ;;  %2366 = vmatprep.subr.bf16.mxu1 %v2532_v10 }
 0x36d   : > { %v1043_v11 = vpack.c.bf16 %v2291_v57, %v2290_v55  ;;  %v3367_v55 = vld [vmem:[%s3593_s5 + $0x2] ss:$0 sm:$0xff] }
 0x36e   : > { %v996_v7 = vpop.f32.mrf.mxu0 }
 0x36f   : > { %v1042_v18 = vpack.c.bf16 %v996_v7, %v993_v56  ;;  %2367 = vmatpush3.bf16.msra.mxu1 %v2532_v10 }
 0x370   : > { %v2294_v58 = vpop.f32.mrf.mxu0  ;;  %2368 = vmatprep.subr.bf16.mxu1 %v2533_v13 }
 0x371   : > { %2320 = vmatprep.mubr.bf16.mxu1 %v1042_v18 }
 0x372   : > { %v1009_v59 = vpop.f32.mrf.mxu0  ;;  %2321 = vmatmul.mubr.bf16.gmra.mxu1 %v1043_v11 }
 0x373   : > { %2369 = vmatpush3.bf16.msra.mxu1 %v2533_v13 }
 0x374   : > { %v2295_v60 = vpop.f32.mrf.mxu0  ;;  %2370 = vmatprep.subr.bf16.mxu1 %v2534_v15 }
 0x375   : > { %v1045_v63 = vpack.c.bf16 %v2295_v60, %v2294_v58 }
 0x376   : > { %v1012_v61 = vpop.f32.mrf.mxu0 }
 0x377   : > { %v1044_v62 = vpack.c.bf16 %v1012_v61, %v1009_v59  ;;  %2371 = vmatpush3.bf16.msra.mxu1 %v2534_v15 }
 0x378   : > { %v2298_v0 = vpop.f32.mrf.mxu0  ;;  %2372 = vmatprep.subr.bf16.mxu1 %v2535_v16 }
 0x379   : > { %2324 = vmatprep.mubr.bf16.mxu1 %v1044_v62 }
 0x37a   : > { %v1025_v1 = vpop.f32.mrf.mxu0  ;;  %2325 = vmatmul.mubr.bf16.gmra.mxu1 %v1045_v63 }
 0x37b   : > { %2373 = vmatpush3.bf16.msra.mxu1 %v2535_v16 }
 0x37c   : > { %v2299_v2 = vpop.f32.mrf.mxu0  ;;  %2374 = vmatprep.subr.bf16.mxu1 %v2536_v8 }
 0x37d   : > { %v1047_v5 = vpack.c.bf16 %v2299_v2, %v2298_v0 }
 0x37e   : > { %v1028_v3 = vpop.f32.mrf.mxu0 }
 0x37f   : > { %v1046_v4 = vpack.c.bf16 %v1028_v3, %v1025_v1  ;;  %2375 = vmatpush3.bf16.msra.mxu1 %v2536_v8 }
 0x381   : > { %2328 = vmatprep.mubr.bf16.mxu1 %v1046_v4 }
 0x382   : > { %2329 = vmatmul.mubr.bf16.gmra.mxu1 %v1047_v5 }
 0x42a   : > { %v2318_v17 = vpop.f32.mrf.mxu1 }
 0x42b   : > { %v3362_v54 = vadd.f32 %v2318_v17, %v3344_v27 }
 0x42c   : > { %v3337_v12 = vpop.f32.mrf.mxu1 }
 0x42e   : > { %v2319_v19 = vpop.f32.mrf.mxu1 }
 0x42f   : > { %v1163_v5 = vadd.f32 %v2319_v19, %v3344_v27 }
 0x430   : > { %v3339_v20 = vpop.f32.mrf.mxu1 }
 0x432   : > { %v2322_v21 = vpop.f32.mrf.mxu1 }
 0x433   : > { %v1176_v56 = vadd.f32 %v2322_v21, %v3344_v27  ;;  %v1216_v21 = vmax.f32 %v3362_v54, 0.0 }
 0x434   : > { %v1167_v22 = vpop.f32.mrf.mxu1 }
 0x435   : > { %v1220_v6 = vmax.f32 %v1176_v56, 0.0  ;;  %v1168_v10 = vadd.f32 %v3344_v27, %v1167_v22 }
 0x436   : > { %v2323_v23 = vpop.f32.mrf.mxu1 }
 0x437   : > { %v1179_v14 = vadd.f32 %v2323_v23, %v3344_v27  ;;  %v3389_v23 = vld [vmem:[%s3593_s5 + $0x3] ss:$0 sm:$0xff] }
 0x438   : > { %v1170_v29 = vpop.f32.mrf.mxu1 }
 0x439   : > { %v1221_v61 = vmax.f32 %v1179_v14, 0.0  ;;  %v1171_v62 = vadd.f32 %v3344_v27, %v1170_v29 }
 0x43a   : > { %v2326_v24 = vpop.f32.mrf.mxu1 }
 0x43b   : > { %v1192_v28 = vadd.f32 %v2326_v24, %v3344_v27  ;;  %v1242_v19 = vmul.f32 %v3354_v46, %v1221_v61  ;;  %v1219_v29 = vmax.f32 %v1171_v62, 0.0 }
 0x43c   : > { %v1183_v25 = vpop.f32.mrf.mxu1 }
 0x43d   : > { %v1224_v43 = vmax.f32 %v1192_v28, 0.0  ;;  %v1184_v44 = vadd.f32 %v3344_v27, %v1183_v25 }
 0x43e   : > { %v2327_v26 = vpop.f32.mrf.mxu1 }
 0x43f   : > { %v1195_v30 = vadd.f32 %v2327_v26, %v3344_v27  ;;  %v1245_v57 = vmul.f32 %v3354_v46, %v1224_v43  ;;  %v1222_v7 = vmax.f32 %v1184_v44, 0.0 }
 0x440   : > { %v1186_v38 = vpop.f32.mrf.mxu1 }
 0x441   : > { %v1225_v39 = vmax.f32 %v1195_v30, 0.0  ;;  %v1187_v47 = vadd.f32 %v3344_v27, %v1186_v38  ;;  %v1266_v13 = vadd.f32 %v3367_v55, %v1245_v57  ;;  %v1243_v15 = vmul.f32 %v3354_v46, %v1222_v7 }
 0x442   : > { %v2330_v40 = vpop.f32.mrf.mxu1  ;;  %v1217_v30 = vmax.f32 %v1163_v5, 0.0  ;;  %v1241_v38 = vmul.f32 %v3354_v46, %v1220_v6 }
 0x443   : > { %v1208_v42 = vadd.f32 %v2330_v40, %v3344_v27  ;;  %v1246_v41 = vmul.f32 %v3354_v46, %v1225_v39  ;;  %v1223_v49 = vmax.f32 %v1187_v47, 0.0  ;;  %v1218_v39 = vmax.f32 %v1168_v10, 0.0 }
 0x444   : > { %v1199_v45 = vpop.f32.mrf.mxu1  ;;  %v1282_v47 = vmax.f32 %v1266_v13, 0.0  ;;  %v1264_v40 = vadd.f32 %v3367_v55, %v1243_v15 }
 0x445   : > { %v1228_v9 = vmax.f32 %v1208_v42, 0.0  ;;  %v1200_v48 = vadd.f32 %v3344_v27, %v1199_v45  ;;  %v1267_v63 = vadd.f32 %v3367_v55, %v1246_v41  ;;  %v1244_v0 = vmul.f32 %v3354_v46, %v1223_v49  ;;  %v3407_v41 = vld [vmem:[%s3593_s5 + $0x4] ss:$0 sm:$0xff] }
 0x446   : > { %v2331_v50 = vpop.f32.mrf.mxu1  ;;  %v1155_v45 = vadd.f32 %v3344_v27, %v3339_v20  ;;  %v1152_v20 = vadd.f32 %v3344_v27, %v3337_v12  ;;  %v1239_v54 = vmul.f32 %v3354_v46, %v1218_v39  ;;  %v1303_v56 = vmul.f32 %v3389_v23, %v1282_v47 }
 0x447   : > { %v1249_v51 = vmul.f32 %v3354_v46, %v1228_v9  ;;  %v1226_v52 = vmax.f32 %v1200_v48, 0.0  ;;  %v1211_v53 = vadd.f32 %v2331_v50, %v3344_v27  ;;  %v1283_v22 = vmax.f32 %v1267_v63, 0.0 }
 0x448   : > { %v1202_v18 = vpop.f32.mrf.mxu1  ;;  %v1265_v24 = vadd.f32 %v3367_v55, %v1244_v0  ;;  %v1263_v9 = vadd.f32 %v3367_v55, %v1242_v19  ;;  %v1240_v48 = vmul.f32 %v3354_v46, %v1219_v29  ;;  %v1280_v57 = vmax.f32 %v1264_v40, 0.0 }
 0x449   : > { %v1270_v11 = vadd.f32 %v3367_v55, %v1249_v51  ;;  %v1247_v58 = vmul.f32 %v3354_v46, %v1226_v52  ;;  %v1229_v59 = vmax.f32 %v1211_v53, 0.0  ;;  %v1203_v60 = vadd.f32 %v3344_v27, %v1202_v18 }
 0x44a   : > { %v1304_v14 = vmul.f32 %v3389_v23, %v1283_v22  ;;  %v1281_v49 = vmax.f32 %v1265_v24, 0.0  ;;  %v1262_v53 = vadd.f32 %v3367_v55, %v1241_v38  ;;  %v1261_v61 = vadd.f32 %v3367_v55, %v1240_v48 }
 0x44b   : > { %v1286_v1 = vmax.f32 %v1270_v11, 0.0  ;;  %v1268_v2 = vadd.f32 %v3367_v55, %v1247_v58  ;;  %v1250_v3 = vmul.f32 %v3354_v46, %v1229_v59  ;;  %v1227_v4 = vmax.f32 %v1203_v60, 0.0 }
 0x44c   : > { %v1238_v58 = vmul.f32 %v3354_v46, %v1217_v30  ;;  %v1215_v59 = vmax.f32 %v1155_v45, 0.0  ;;  %v1279_v60 = vmax.f32 %v1263_v9, 0.0  ;;  %v1302_v12 = vmul.f32 %v3389_v23, %v1281_v49 }
 0x44d   : > { %v1284_v16 = vmax.f32 %v1268_v2, 0.0  ;;  %v1271_v8 = vadd.f32 %v3367_v55, %v1250_v3  ;;  %v1248_v17 = vmul.f32 %v3354_v46, %v1227_v4  ;;  %v1307_v25 = vmul.f32 %v3389_v23, %v1286_v1 }
 0x44e   : > { %v1325_v62 = vadd.f32 %v3407_v41, %v1304_v14  ;;  %v1237_v63 = vmul.f32 %v3354_v46, %v1216_v21  ;;  %v1214_v0 = vmax.f32 %v1152_v20, 0.0  ;;  %v1278_v1 = vmax.f32 %v1262_v53, 0.0 }
 0x44f   : > { %v1287_v26 = vmax.f32 %v1271_v8, 0.0  ;;  %v1269_v28 = vadd.f32 %v3367_v55, %v1248_v17  ;;  %v1305_v42 = vmul.f32 %v3389_v23, %v1284_v16  ;;  %v1328_v51 = vadd.f32 %v3407_v41, %v1307_v25 }
 0x450   : > { %v1260_v2 = vadd.f32 %v3367_v55, %v1239_v54  ;;  %v1301_v3 = vmul.f32 %v3389_v23, %v1280_v57  ;;  %v1324_v4 = vadd.f32 %v3407_v41, %v1303_v56  ;;  %v1259_v5 = vadd.f32 %v3367_v55, %v1238_v58 }
 0x451   : > { %v1308_v43 = vmul.f32 %v3389_v23, %v1287_v26  ;;  %v1285_v44 = vmax.f32 %v1269_v28, 0.0  ;;  %v1326_v18 = vadd.f32 %v3407_v41, %v1305_v42  ;;  %v1236_v6 = vmul.f32 %v3354_v46, %v1215_v59 }
 0x452   : > { %v1300_v10 = vmul.f32 %v3389_v23, %v1279_v60  ;;  %v1277_v13 = vmax.f32 %v1261_v61, 0.0  ;;  %v1335_v15 = vpack.c.bf16 %v1325_v62, %v1324_v4  ;;  %v1323_v16 = vadd.f32 %v3407_v41, %v1302_v12 }
 0x453   : > { %v1306_v50 = vmul.f32 %v3389_v23, %v1285_v44  ;;  %v1329_v52 = vadd.f32 %v3407_v41, %v1308_v43  ;;  %v1258_v8 = vadd.f32 %v3367_v55, %v1237_v63  ;;  %v1235_v17 = vmul.f32 %v3354_v46, %v1214_v0 }
 0x454   : > { %v1299_v21 = vmul.f32 %v3389_v23, %v1278_v1  ;;  %v1276_v19 = vmax.f32 %v1260_v2, 0.0  ;;  %v1322_v29 = vadd.f32 %v3407_v41, %v1301_v3  ;;  %v1275_v22 = vmax.f32 %v1259_v5, 0.0  ;;  %v3458_v3 = vld [vmem:[#allocation13] ss:$0 sm:$0xff] }
 0x455   : > { %v1337_v7 = vpack.c.bf16 %v1329_v52, %v1328_v51  ;;  %v1327_v11 = vadd.f32 %v3407_v41, %v1306_v50  ;;  %v1257_v24 = vadd.f32 %v3367_v55, %v1236_v6  ;;  %v1298_v25 = vmul.f32 %v3389_v23, %v1277_v13 }
 0x456   : > { %v1334_v26 = vpack.c.bf16 %v1323_v16, %v1322_v29  ;;  %v1321_v28 = vadd.f32 %v3407_v41, %v1300_v10  ;;  %v1274_v30 = vmax.f32 %v1258_v8, 0.0  ;;  %v1256_v38 = vadd.f32 %v3367_v55, %v1235_v17  ;;  %v3464_v10 = vld [vmem:[%s3596_s8] ss:$0 sm:$0xff] }
 0x457   : > { %2332 = vmatprep.subr.bf16.mxu0 %v1337_v7  ;;  %v1336_v27 = vpack.c.bf16 %v1327_v11, %v1326_v18  ;;  %v1297_v46 = vmul.f32 %v3389_v23, %v1276_v19  ;;  %v1320_v39 = vadd.f32 %v3407_v41, %v1299_v21  ;;  %v1296_v47 = vmul.f32 %v3389_v23, %v1275_v22 }
 0x458   : > { %2333 = vmatpush3.bf16.msra.mxu0 %v1337_v7  ;;  %v1273_v40 = vmax.f32 %v1257_v24, 0.0  ;;  %v1319_v43 = vadd.f32 %v3407_v41, %v1298_v25  ;;  %v1295_v44 = vmul.f32 %v3389_v23, %v1274_v30  ;;  %v1272_v45 = vmax.f32 %v1256_v38, 0.0 }
 0x459   : > { %2334 = vmatprep.subr.bf16.mxu0 %v1336_v27  ;;  %v1333_v42 = vpack.c.bf16 %v1321_v28, %v1320_v39  ;;  %v1318_v9 = vadd.f32 %v3407_v41, %v1297_v46  ;;  %v1317_v14 = vadd.f32 %v3407_v41, %v1296_v47 }
 0x45a   : > { %v1294_v55 = vmul.f32 %v3389_v23, %v1273_v40  ;;  %v1293_v49 = vmul.f32 %v3389_v23, %v1272_v45  ;;  %v1316_v50 = vadd.f32 %v3407_v41, %v1295_v44  ;;  %v2537_v23 = vld [vmem:[#allocation11 + $0x8] sm:$0xff]  }
 0x45b   : > { %v1332_v48 = vpack.c.bf16 %v1319_v43, %v1318_v9  ;;  %2376 = vmatprep.subr.bf16.mxu1 %v2537_v23 }
 0x45c   : > { %2335 = vmatpush3.bf16.msra.mxu0 %v1336_v27  ;;  %v1331_v51 = vpack.c.bf16 %v1317_v14, %v1316_v50  ;;  %v1315_v52 = vadd.f32 %v3407_v41, %v1294_v55  ;;  %v1314_v20 = vadd.f32 %v3407_v41, %v1293_v49  ;;  %2377 = vmatpush3.bf16.msra.mxu1 %v2537_v23  ;;  %v2538_v41 = vld [vmem:[#allocation11] sm:$0xff]  }
 0x45d   : > { %2336 = vmatprep.subr.bf16.mxu0 %v1335_v15  ;;  %2378 = vmatprep.subr.bf16.mxu1 %v2538_v41 }
 0x45e   : > { %v1330_v53 = vpack.c.bf16 %v1315_v52, %v1314_v20 }
 0x460   : > { %2337 = vmatpush3.bf16.msra.mxu0 %v1335_v15  ;;  %2379 = vmatpush3.bf16.msra.mxu1 %v2538_v41 }
 0x461   : > { %2338 = vmatprep.subr.bf16.mxu0 %v1334_v26 }
 0x464   : > { %2339 = vmatpush3.bf16.msra.mxu0 %v1334_v26 }
 0x465   : > { %2340 = vmatprep.subr.bf16.mxu0 %v1333_v42 }
 0x468   : > { %2341 = vmatpush3.bf16.msra.mxu0 %v1333_v42 }
 0x469   : > { %2342 = vmatprep.subr.bf16.mxu0 %v1332_v48 }
 0x46c   : > { %2343 = vmatpush3.bf16.msra.mxu0 %v1332_v48 }
 0x46d   : > { %2344 = vmatprep.subr.bf16.mxu0 %v1331_v51 }
 0x470   : > { %2345 = vmatpush3.bf16.msra.mxu0 %v1331_v51 }
 0x471   : > { %2346 = vmatprep.subr.bf16.mxu0 %v1330_v53 }
 0x474   : > { %2347 = vmatpush3.bf16.msra.mxu0 %v1330_v53 }
 0x477   : > { %2349 = vmatmul.mubr.bf16.vlgmr.msra.gmra.mxu0 %v3202_v31 }
 0x478   : > { %2352 = vmatprep.mubr.bf16.mxu0 %v3205_v32 }
 0x47f   : > { %2353 = vmatmul.mubr.bf16.gmra.mxu0 %v3210_v33 }
 0x480   : > { %2356 = vmatprep.mubr.bf16.mxu0 %v3213_v34 }
 0x487   : > { %2357 = vmatmul.mubr.bf16.gmra.mxu0 %v3218_v35 }
 0x488   : > { %2360 = vmatprep.mubr.bf16.mxu0 %v3221_v36 }
 0x48f   : > { %2361 = vmatmul.mubr.bf16.gmra.mxu0 %v3226_v37 }
 0x537   : > { %v2350_v54 = vpop.f32.mrf.mxu0 }
 0x539   : > { %v1372_v31 = vpop.f32.mrf.mxu0 }
 0x53b   : > { %v2351_v56 = vpop.f32.mrf.mxu0 }
 0x53c   : > { %v1436_v33 = vpack.c.bf16 %v2351_v56, %v2350_v54 }
 0x53d   : > { %v1375_v32 = vpop.f32.mrf.mxu0 }
 0x53e   : > { %v1435_v57 = vpack.c.bf16 %v1375_v32, %v1372_v31 }
 0x53f   : > { %v2354_v7 = vpop.f32.mrf.mxu0 }
 0x540   : > { %2380 = vmatprep.mubr.bf16.mxu1 %v1435_v57 }
 0x541   : > { %v1388_v34 = vpop.f32.mrf.mxu0  ;;  %2381 = vmatmul.mubr.bf16.vlgmr.msra.gmra.mxu1 %v1436_v33 }
 0x543   : > { %v2355_v35 = vpop.f32.mrf.mxu0 }
 0x544   : > { %v1438_v37 = vpack.c.bf16 %v2355_v35, %v2354_v7 }
 0x545   : > { %v1391_v36 = vpop.f32.mrf.mxu0 }
 0x546   : > { %v1437_v18 = vpack.c.bf16 %v1391_v36, %v1388_v34 }
 0x547   : > { %v2358_v11 = vpop.f32.mrf.mxu0 }
 0x548   : > { %2384 = vmatprep.mubr.bf16.mxu1 %v1437_v18 }
 0x549   : > { %v1404_v58 = vpop.f32.mrf.mxu0  ;;  %2385 = vmatmul.mubr.bf16.gmra.mxu1 %v1438_v37 }
 0x54b   : > { %v2359_v59 = vpop.f32.mrf.mxu0 }
 0x54c   : > { %v1440_v60 = vpack.c.bf16 %v2359_v59, %v2358_v11 }
 0x54d   : > { %v1407_v61 = vpop.f32.mrf.mxu0 }
 0x54e   : > { %v1439_v12 = vpack.c.bf16 %v1407_v61, %v1404_v58 }
 0x54f   : > { %v2362_v27 = vpop.f32.mrf.mxu0 }
 0x550   : > { %2388 = vmatprep.mubr.bf16.mxu1 %v1439_v12 }
 0x551   : > { %v1420_v62 = vpop.f32.mrf.mxu0  ;;  %2389 = vmatmul.mubr.bf16.gmra.mxu1 %v1440_v60 }
 0x553   : > { %v2363_v63 = vpop.f32.mrf.mxu0 }
 0x554   : > { %v1442_v0 = vpack.c.bf16 %v2363_v63, %v2362_v27 }
 0x555   : > { %v1423_v1 = vpop.f32.mrf.mxu0 }
 0x556   : > { %v1441_v2 = vpack.c.bf16 %v1423_v1, %v1420_v62 }
 0x558   : > { %2392 = vmatprep.mubr.bf16.mxu1 %v1441_v2 }
 0x559   : > { %2393 = vmatmul.mubr.bf16.gmra.mxu1 %v1442_v0 }
 0x601   : > { %v2382_v4 = vpop.f32.mrf.mxu1 }
 0x602   : > { %v1555_v5 = vadd.f32 %v2382_v4, %v3458_v3 }
 0x603   : > { %v1546_v6 = vpop.f32.mrf.mxu1 }
 0x604   : > { %v1611_v13 = vmax.f32 %v1555_v5, 0.0  ;;  %v1547_v15 = vadd.f32 %v3458_v3, %v1546_v6  ;;  %v2882_v6 = vmov 0  }
 0x605   : > { %v2383_v16 = vpop.f32.mrf.mxu1  ;;  %2505 = vset.pattern.permute.xlu1 %v2882_v6  ;;  %2506 = vset.pattern.permute.xlu0 %v2882_v6 }
 0x606   : > { %v1609_v8 = vmax.f32 %v1547_v15, 0.0  ;;  %v1558_v17 = vadd.f32 %v2383_v16, %v3458_v3  ;;  %v1632_v21 = vmul.f32 %v3464_v10, %v1611_v13 }
 0x607   : > { %v1549_v19 = vpop.f32.mrf.mxu1 }
 0x608   : > { %v1612_v29 = vmax.f32 %v1558_v17, 0.0  ;;  %v1550_v22 = vadd.f32 %v3458_v3, %v1549_v19  ;;  %1650 = vadd.xlane.f32.xlu1 %v1632_v21  ;;  %v1630_v24 = vmul.f32 %v3464_v10, %v1609_v8 }
 0x609   : > { %v2386_v25 = vpop.f32.mrf.mxu1 }
 0x60a   : > { %v1610_v26 = vmax.f32 %v1550_v22, 0.0  ;;  %v1571_v28 = vadd.f32 %v2386_v25, %v3458_v3  ;;  %1646 = vadd.xlane.f32.xlu0 %v1630_v24  ;;  %v1633_v30 = vmul.f32 %v3464_v10, %v1612_v29 }
 0x60b   : > { %v1562_v38 = vpop.f32.mrf.mxu1 }
 0x60c   : > { %v1615_v46 = vmax.f32 %v1571_v28, 0.0  ;;  %v1563_v39 = vadd.f32 %v3458_v3, %v1562_v38  ;;  %1652 = vadd.xlane.f32.xlu1 %v1633_v30  ;;  %v1631_v47 = vmul.f32 %v3464_v10, %v1610_v26 }
 0x60d   : > { %v2387_v40 = vpop.f32.mrf.mxu1 }
 0x60e   : > { %v1574_v42 = vadd.f32 %v2387_v40, %v3458_v3  ;;  %1648 = vadd.xlane.f32.xlu0 %v1631_v47  ;;  %v1613_v44 = vmax.f32 %v1563_v39, 0.0  ;;  %v1636_v55 = vmul.f32 %v3464_v10, %v1615_v46 }
 0x60f   : > { %v1565_v43 = vpop.f32.mrf.mxu1 }
 0x610   : > { %v1616_v45 = vmax.f32 %v1574_v42, 0.0  ;;  %v1566_v9 = vadd.f32 %v3458_v3, %v1565_v43  ;;  %v1634_v53 = vmul.f32 %v3464_v10, %v1613_v44 }
 0x611   : > { %v2390_v48 = vpop.f32.mrf.mxu1 }
 0x612   : > { %v1614_v14 = vmax.f32 %v1566_v9, 0.0  ;;  %v1587_v49 = vadd.f32 %v2390_v48, %v3458_v3  ;;  %1658 = vadd.xlane.f32.xlu0 %v1636_v55  ;;  %v1637_v50 = vmul.f32 %v3464_v10, %v1616_v45 }
 0x613   : > { %v1578_v51 = vpop.f32.mrf.mxu1 }
 0x614   : > { %v1619_v52 = vmax.f32 %v1587_v49, 0.0  ;;  %v1579_v20 = vadd.f32 %v3458_v3, %v1578_v51  ;;  %1660 = vadd.xlane.f32.xlu1 %v1637_v50  ;;  %v1635_v54 = vmul.f32 %v3464_v10, %v1614_v14 }
 0x615   : > { %v2391_v23 = vpop.f32.mrf.mxu1 }
 0x616   : > { %v1590_v41 = vadd.f32 %v2391_v23, %v3458_v3  ;;  %1654 = vadd.xlane.f32.xlu0 %v1634_v53  ;;  %v1617_v56 = vmax.f32 %v1579_v20, 0.0  ;;  %v1640_v33 = vmul.f32 %v3464_v10, %v1619_v52 }
 0x617   : > { %v1581_v31 = vpop.f32.mrf.mxu1 }
 0x618   : > { %v1620_v32 = vmax.f32 %v1590_v41, 0.0  ;;  %v1582_v57 = vadd.f32 %v3458_v3, %v1581_v31  ;;  %1656 = vadd.xlane.f32.xlu1 %v1635_v54  ;;  %v1638_v11 = vmul.f32 %v3464_v10, %v1617_v56 }
 0x619   : > { %v2394_v7 = vpop.f32.mrf.mxu1 }
 0x61a   : > { %v1618_v34 = vmax.f32 %v1582_v57, 0.0  ;;  %1666 = vadd.xlane.f32.xlu0 %v1640_v33  ;;  %v1641_v35 = vmul.f32 %v3464_v10, %v1620_v32  ;;  %v1603_v18 = vadd.f32 %v2394_v7, %v3458_v3 }
 0x61b   : > { %v1594_v36 = vpop.f32.mrf.mxu1 }
 0x61c   : > { %v1595_v37 = vadd.f32 %v3458_v3, %v1594_v36  ;;  %1668 = vadd.xlane.f32.xlu1 %v1641_v35  ;;  %v1639_v60 = vmul.f32 %v3464_v10, %v1618_v34  ;;  %v1623_v12 = vmax.f32 %v1603_v18, 0.0 }
 0x61d   : > { %v2395_v58 = vpop.f32.mrf.mxu1 }
 0x61e   : > { %v1621_v59 = vmax.f32 %v1595_v37, 0.0  ;;  %1662 = vadd.xlane.f32.xlu0 %v1638_v11  ;;  %v1606_v27 = vadd.f32 %v2395_v58, %v3458_v3  ;;  %v1644_v4 = vmul.f32 %v3464_v10, %v1623_v12 }
 0x61f   : > { %v1597_v61 = vpop.f32.mrf.mxu1 }
 0x620   : > { %v1598_v62 = vadd.f32 %v3458_v3, %v1597_v61  ;;  %1664 = vadd.xlane.f32.xlu1 %v1639_v60  ;;  %v1642_v63 = vmul.f32 %v3464_v10, %v1621_v59  ;;  %v1624_v1 = vmax.f32 %v1606_v27, 0.0  ;;  %v3500_v3 = vld [vmem:[%s3596_s8 + $0x1] ss:$0 sm:$0xff] }
 0x622   : > { %v1622_v0 = vmax.f32 %v1598_v62, 0.0  ;;  %1670 = vadd.xlane.f32.xlu0 %v1642_v63  ;;  %v1645_v5 = vmul.f32 %v3464_v10, %v1624_v1 }
 0x624   : > { %v1643_v2 = vmul.f32 %v3464_v10, %v1622_v0 }
 0x626   : > { %1672 = vadd.xlane.f32.xlu1 %v1643_v2  ;;  %1674 = vadd.xlane.f32.xlu0 %v1644_v4 }
 0x62a   : > { %1676 = vadd.xlane.f32.xlu1 %v1645_v5 }
 0x691   : > { %v1651_v13 = vpop.xlane.xlu1 %1650 }
 0x692   : > { %v1685_v15 = vadd.f32 %v3500_v3, %v1651_v13 }
 0x693   : > { %v1647_v16 = vpop.xlane.xlu0 %1646 }
 0x694   : > { %v1701_v8 = vsub.f32 0.0, %v1685_v15  ;;  %v1683_v17 = vadd.f32 %v3500_v3, %v1647_v16 }
 0x695   : > { %v1653_v21 = vpop.xlane.xlu1 %1652 }
 0x696   : > { %v1719_v19 = vmul.f32 1.442695, %v1701_v8  ;;  %v1699_v29 = vsub.f32 0.0, %v1683_v17  ;;  %v1686_v10 = vadd.f32 %v3500_v3, %v1653_v21 }
 0x697   : > { %v1649_v22 = vpop.xlane.xlu0 %1648 }
 0x698   : > { %2539 = vpow2.f32 %v1719_v19  ;;  %v1715_v24 = vmul.f32 1.442695, %v1699_v29  ;;  %v1702_v25 = vsub.f32 0.0, %v1686_v10  ;;  %v1684_v26 = vadd.f32 %v3500_v3, %v1649_v22 }
 0x69a   : > { %2541 = vpow2.f32 %v1715_v24  ;;  %v1721_v28 = vmul.f32 1.442695, %v1702_v25  ;;  %v1700_v30 = vsub.f32 0.0, %v1684_v26 }
 0x69b   : > { %v1659_v38 = vpop.xlane.xlu0 %1658 }
 0x69c   : > { %2543 = vpow2.f32 %v1721_v28  ;;  %v1717_v46 = vmul.f32 1.442695, %v1700_v30  ;;  %v1689_v39 = vadd.f32 %v3500_v3, %v1659_v38 }
 0x69d   : > { %v1661_v47 = vpop.xlane.xlu1 %1660 }
 0x69e   : > { %2545 = vpow2.f32 %v1717_v46  ;;  %v1705_v40 = vsub.f32 0.0, %v1689_v39  ;;  %v1690_v42 = vadd.f32 %v3500_v3, %v1661_v47 }
 0x69f   : > { %v1655_v43 = vpop.xlane.xlu0 %1654 }
 0x6a0   : > { %v1727_v44 = vmul.f32 1.442695, %v1705_v40  ;;  %v1706_v45 = vsub.f32 0.0, %v1690_v42  ;;  %v1687_v9 = vadd.f32 %v3500_v3, %v1655_v43 }
 0x6a1   : > { %v1657_v55 = vpop.xlane.xlu1 %1656 }
 0x6a2   : > { %2547 = vpow2.f32 %v1727_v44  ;;  %v1729_v48 = vmul.f32 1.442695, %v1706_v45  ;;  %v1703_v14 = vsub.f32 0.0, %v1687_v9  ;;  %v1688_v49 = vadd.f32 %v3500_v3, %v1657_v55 }
 0x6a3   : > { %v1667_v50 = vpop.xlane.xlu0 %1666 }
 0x6a4   : > { %v1723_v51 = vmul.f32 1.442695, %v1703_v14  ;;  %v1704_v52 = vsub.f32 0.0, %v1688_v49  ;;  %v1693_v20 = vadd.f32 %v3500_v3, %v1667_v50  ;;  %2549 = vpow2.f32 %v1729_v48 }
 0x6a5   : > { %v2540_v53 = vpop.eup %2539  ;;  %v1669_v23 = vpop.xlane.xlu1 %1668 }
 0x6a6   : > { %v1749_v41 = vadd.f32 1.0, %v2540_v53  ;;  %2551 = vpow2.f32 %v1723_v51  ;;  %v1709_v54 = vsub.f32 0.0, %v1693_v20  ;;  %v1725_v56 = vmul.f32 1.442695, %v1704_v52 }
 0x6a7   : > { %v2542_v31 = vpop.eup %2541  ;;  %v1694_v32 = vadd.f32 %v3500_v3, %v1669_v23  ;;  %v1663_v57 = vpop.xlane.xlu0 %1662 }
 0x6a8   : > { %2553 = vrcp.f32 %v1749_v41  ;;  %v1747_v33 = vadd.f32 1.0, %v2542_v31  ;;  %v1691_v7 = vadd.f32 %v3500_v3, %v1663_v57  ;;  %v1735_v37 = vmul.f32 1.442695, %v1709_v54 }
 0x6a9   : > { %v2544_v34 = vpop.eup %2543  ;;  %v1710_v35 = vsub.f32 0.0, %v1694_v32  ;;  %v1665_v36 = vpop.xlane.xlu1 %1664 }
 0x6aa   : > { %2555 = vrcp.f32 %v1747_v33  ;;  %v1750_v18 = vadd.f32 1.0, %v2544_v34  ;;  %v1692_v11 = vadd.f32 %v3500_v3, %v1665_v36  ;;  %v1707_v60 = vsub.f32 0.0, %v1691_v7 }
 0x6ab   : > { %v2546_v58 = vpop.eup %2545  ;;  %2557 = vpow2.f32 %v1725_v56  ;;  %v1737_v59 = vmul.f32 1.442695, %v1710_v35  ;;  %v1671_v61 = vpop.xlane.xlu0 %1670 }
 0x6ac   : > { %2559 = vrcp.f32 %v1750_v18  ;;  %v1748_v12 = vadd.f32 1.0, %v2546_v58  ;;  %v1708_v27 = vsub.f32 0.0, %v1692_v11  ;;  %v1695_v62 = vadd.f32 %v3500_v3, %v1671_v61 }
 0x6ad   : > { %2561 = vpow2.f32 %v1737_v59  ;;  %v1731_v1 = vmul.f32 1.442695, %v1707_v60 }
 0x6ae   : > { %2563 = vpow2.f32 %v1735_v37  ;;  %v1733_v63 = vmul.f32 1.442695, %v1708_v27  ;;  %v1711_v2 = vsub.f32 0.0, %v1695_v62 }
 0x6af   : > { %v2548_v0 = vpop.eup %2547  ;;  %2565 = vrcp.f32 %v1748_v12  ;;  %v1673_v4 = vpop.xlane.xlu1 %1672 }
 0x6b0   : > { %v1675_v5 = vpop.xlane.xlu0 %1674  ;;  %v1753_v6 = vadd.f32 1.0, %v2548_v0  ;;  %2567 = vpow2.f32 %v1733_v63  ;;  %v1696_v13 = vadd.f32 %v3500_v3, %v1673_v4  ;;  %v1739_v8 = vmul.f32 1.442695, %v1711_v2 }
 0x6b1   : > { %v1697_v15 = vadd.f32 %v3500_v3, %v1675_v5  ;;  %v2550_v16 = vpop.eup %2549  ;;  %2569 = vpow2.f32 %v1731_v1 }
 0x6b2   : > { %v1712_v17 = vsub.f32 0.0, %v1696_v13  ;;  %2571 = vrcp.f32 %v1753_v6  ;;  %v1754_v26 = vadd.f32 1.0, %v2550_v16 }
 0x6b3   : > { %v2552_v21 = vpop.eup %2551  ;;  %v1713_v19 = vsub.f32 0.0, %v1697_v15  ;;  %v1677_v29 = vpop.xlane.xlu1 %1676  ;;  %2573 = vpow2.f32 %v1739_v8 }
 0x6b4   : > { %v1751_v10 = vadd.f32 1.0, %v2552_v21  ;;  %v1741_v22 = vmul.f32 1.442695, %v1712_v17  ;;  %v1698_v25 = vadd.f32 %v3500_v3, %v1677_v29 }
 0x6b5   : > { %v2554_v24 = vpop.eup %2553  ;;  %v1743_v30 = vmul.f32 1.442695, %v1713_v19 }
 0x6b6   : > { %1791 = vperm.xlu1 %2505, %v2554_v24   ;;  %2575 = vpow2.f32 %v1741_v22  ;;  %v1714_v38 = vsub.f32 0.0, %v1698_v25 }
 0x6b7   : > { %v2556_v28 = vpop.eup %2555  ;;  %2577 = vrcp.f32 %v1751_v10 }
 0x6b8   : > { %v2558_v46 = vpop.eup %2557  ;;  %1781 = vperm.xlu0 %2506, %v2556_v28   ;;  %v1745_v47 = vmul.f32 1.442695, %v1714_v38  ;;  %2579 = vrcp.f32 %v1754_v26 }
 0x6b9   : > { %v2560_v39 = vpop.eup %2559  ;;  %v1752_v43 = vadd.f32 1.0, %v2558_v46  ;;  %2581 = vpow2.f32 %v1743_v30 }
 0x6ba   : > { %v2562_v40 = vpop.eup %2561  ;;  %1796 = vperm.xlu1 %2505, %v2560_v39   ;;  %2583 = vpow2.f32 %v1745_v47 }
 0x6bb   : > { %v2564_v42 = vpop.eup %2563  ;;  %v1758_v44 = vadd.f32 1.0, %v2562_v40 }
 0x6bc   : > { %v2566_v3 = vpop.eup %2565  ;;  %v1757_v48 = vadd.f32 1.0, %v2564_v42 }
 0x6bd   : > { %v2568_v45 = vpop.eup %2567  ;;  %2585 = vrcp.f32 %v1758_v44 }
 0x6be   : > { %v1756_v9 = vadd.f32 1.0, %v2568_v45  ;;  %1786 = vperm.xlu1 %2505, %v2566_v3   ;;  %2587 = vrcp.f32 %v1752_v43  ;;  %v2570_v55 = vpop.eup %2569 }
 0x6bf   : > { %v2572_v14 = vpop.eup %2571  ;;  %v1755_v51 = vadd.f32 1.0, %v2570_v55 }
 0x6c0   : > { %2589 = vrcp.f32 %v1756_v9  ;;  %v2574_v49 = vpop.eup %2573 }
 0x6c1   : > { %2591 = vrcp.f32 %v1757_v48  ;;  %v1759_v23 = vadd.f32 1.0, %v2574_v49 }
 0x6c2   : > { %1811 = vperm.xlu1 %2505, %v2572_v14  }
 0x6c3   : > { %v2576_v50 = vpop.eup %2575 }
 0x6c4   : > { %v2578_v52 = vpop.eup %2577  ;;  %v1760_v20 = vadd.f32 1.0, %v2576_v50 }
 0x6c5   : > { %v2580_v53 = vpop.eup %2579 }
 0x6c6   : > { %1801 = vperm.xlu1 %2505, %v2578_v52   ;;  %2593 = vrcp.f32 %v1760_v20  ;;  %v2582_v41 = vpop.eup %2581 }
 0x6c7   : > { %2595 = vrcp.f32 %v1755_v51  ;;  %v2584_v54 = vpop.eup %2583  ;;  %v1761_v57 = vadd.f32 1.0, %v2582_v41 }
 0x6c8   : > { %v1762_v56 = vadd.f32 1.0, %v2584_v54  ;;  %2597 = vrcp.f32 %v1759_v23 }
 0x6ca   : > { %v2586_v31 = vpop.eup %2585  ;;  %1816 = vperm.xlu1 %2505, %v2580_v53   ;;  %2599 = vrcp.f32 %v1762_v56 }
 0x6cb   : > { %1836 = vperm.xlu0 %2506, %v2586_v31   ;;  %v2588_v32 = vpop.eup %2587  ;;  %2601 = vrcp.f32 %v1761_v57 }
 0x6cd   : > { %v2590_v33 = vpop.eup %2589 }
 0x6ce   : > { %1806 = vperm.xlu1 %2505, %v2588_v32   ;;  %v2592_v7 = vpop.eup %2591 }
 0x6cf   : > { %1826 = vperm.xlu0 %2506, %v2590_v33  }
 0x6d2   : > { %1831 = vperm.xlu1 %2505, %v2592_v7  }
 0x6d3   : > { %v2594_v34 = vpop.eup %2593 }
 0x6d4   : > { %v2596_v35 = vpop.eup %2595  ;;  %1846 = vperm.xlu0 %2506, %v2594_v34  }
 0x6d5   : > { %v2598_v36 = vpop.eup %2597 }
 0x6d6   : > { %1821 = vperm.xlu1 %2505, %v2596_v35  }
 0x6d7   : > { %v2600_v18 = vpop.eup %2599 }
 0x6d8   : > { %1856 = vperm.xlu0 %2506, %v2600_v18   ;;  %v2602_v37 = vpop.eup %2601 }
 0x6da   : > { %1841 = vperm.xlu1 %2505, %v2598_v36  }
 0x6de   : > { %1851 = vperm.xlu1 %2505, %v2602_v37  }
 0x731   : > { %v1792_v11 = vpop.permute.xlu1 %1791 }
 0x732   : > { %1861 = vst [vmem:[%s3520_s4 + $0x10] sm:$0xff] %v1792_v11 }
 0x733   : > { %v1782_v58 = vpop.permute.xlu0 %1781 }
 0x734   : > { %1859 = vst [vmem:[%s3520_s4] sm:$0xff] %v1782_v58 }
 0x735   : > { %v1797_v59 = vpop.permute.xlu1 %1796 }
 0x736   : > { %1862 = vst [vmem:[%s3520_s4 + $0x18] sm:$0xff] %v1797_v59 }
 0x739   : > { %v1787_v60 = vpop.permute.xlu1 %1786 }
 0x73a   : > { %1860 = vst [vmem:[%s3520_s4 + $0x8] sm:$0xff] %v1787_v60 }
 0x73d   : > { %v1812_v61 = vpop.permute.xlu1 %1811 }
 0x73e   : > { %1865 = vst [vmem:[%s3520_s4 + $0x30] sm:$0xff] %v1812_v61 }
 0x741   : > { %v1802_v12 = vpop.permute.xlu1 %1801 }
 0x742   : > { %1863 = vst [vmem:[%s3520_s4 + $0x20] sm:$0xff] %v1802_v12 }
 0x745   : > { %v1817_v27 = vpop.permute.xlu1 %1816 }
 0x746   : > { %1866 = vst [vmem:[%s3520_s4 + $0x38] sm:$0xff] %v1817_v27  ;;  %v1837_v62 = vpop.permute.xlu0 %1836 }
 0x747   : > { %1870 = vst [vmem:[%s3520_s4 + $0x58] sm:$0xff] %v1837_v62 }
 0x749   : > { %v1807_v63 = vpop.permute.xlu1 %1806 }
 0x74a   : > { %1864 = vst [vmem:[%s3520_s4 + $0x28] sm:$0xff] %v1807_v63  ;;  %v1827_v0 = vpop.permute.xlu0 %1826 }
 0x74b   : > { %1868 = vst [vmem:[%s3520_s4 + $0x48] sm:$0xff] %v1827_v0 }
 0x74d   : > { %v1832_v1 = vpop.permute.xlu1 %1831 }
 0x74e   : > { %1869 = vst [vmem:[%s3520_s4 + $0x50] sm:$0xff] %v1832_v1 }
 0x74f   : > { %v1847_v2 = vpop.permute.xlu0 %1846 }
 0x750   : > { %1872 = vst [vmem:[%s3520_s4 + $0x68] sm:$0xff] %v1847_v2 }
 0x751   : > { %v1822_v4 = vpop.permute.xlu1 %1821 }
 0x752   : > { %1867 = vst [vmem:[%s3520_s4 + $0x40] sm:$0xff] %v1822_v4 }
 0x753   : > { %v1857_v5 = vpop.permute.xlu0 %1856 }
 0x754   : > { %1874 = vst [vmem:[%s3520_s4 + $0x78] sm:$0xff] %v1857_v5 }
 0x755   : > { %v1842_v6 = vpop.permute.xlu1 %1841 }
 0x756   : > { %1871 = vst [vmem:[%s3520_s4 + $0x60] sm:$0xff] %v1842_v6 }
 0x759   : > { %v1852_v13 = vpop.permute.xlu1 %1851 }
 0x75a   : > { %1873 = vst [vmem:[%s3520_s4 + $0x70] sm:$0xff] %v1852_v13 }
 0x75b   : > { %2802 = shalt.err (!%p2799_p9)
}
 0x75c   : > { %s2803_s6 = scalar_lea.hbm %s3542_s13, 2048  ;;  %s2807_s23 = scalar_lea.hbm %s3597_s9, 4096 }
 0x75d   : > { %p2804_p3 = scmp.ne.s32.totalorder %s3542_s13, %s2803_s6  ;;  %p2808_p2 = scmp.lt.s32.totalorder %s3542_s13, %s3597_s9 }
 0x75e   : > { %p2809_p10 = scmp.lt.s32.totalorder %s2807_s23, %s2803_s6 }
 0x75f   : > { %p2805_p7 = pnand %p2804_p3, %p3634_p5 }
 0x760   : > { %p2810_p0 = por %p2809_p10, %p2808_p2 }
 0x761   : > { %p2806_p12 = pneg %p2805_p7 }
 0x763   : > { %p2811_p13 = pnand %p2810_p0, %p2806_p12 }
 0x765   : > { %2814 = shalt.err (!%p2811_p13)
}
 0x766   : > { %s2884_s28 = smov 128   ;;  %s2885_s20 = smov 8  }
 0x767   : > { %2420 = dma.vmem_to_hbm [thread:$0]  (%p3634_p5), %s3544_s16, 2048, %s3542_s13, %s1876_s18, %s2884_s28, %s2884_s28, %s2885_s20  }
 0x768 PF: > { %s1904_s4 = sand.u32 1, %s2857_s30   ;;  %p3635_p8 = scmp.ne.s32.totalorder %s3620_s21, 0 }
 0x769   : > { %p3636_p11 = scmp.ge.s32.totalorder %s2869_s12, 2  ;;  %s1905_s7 = scalar_lea.sflag [#allocation4], %s1904_s4 }
 0x76b   : > { %p2446_p1 = pnand %p3636_p11, %p3635_p8 }
 0x76d   : > { %p2447_p4 = pneg %p2446_p1 }
 0x76f   : > { %2852 = dma.done.wait (%p2447_p4), %s1905_s7, 2048  }
 0x770   : > { %2854 = vsyncadd (%p2447_p4), %s1905_s7, 4294965248  ;;  %s3637_s24 = sld [smem:[#allocation21_spill]]  ;;  %p27_p6 = scmp.ge.s32.totalorder %s3034_s19, 4  }
 0x771   : > { %s3638_s30 = smov %s2861_s10  ;;  %s3639_s10 = smov %s2865_s11 }
 0x772   : > { %s3641_s12 = smov %s3034_s19  ;;  %29 = sbr.rel (!%p27_p6) target bundleno = 16 (0x10), region = 134 }
 0x776   : > { %s3640_s11 = smov %s3637_s24 }
 0x777   :  { %1910 = vsyncpa [#allocation3], 1 }
 0x778   :  { %1912 = vsyncpa [#allocation3 + $0x1], 1 }
 0x779   :  { %1913 = vsyncpa [#allocation6], 1 }
 0x77a   :  { %1915 = vsyncpa [#allocation6 + $0x1], 1 }
 0x77b   :  { %1916 = vsyncpa [#allocation9], 1 }
 0x77c   :  { %1917 = vsyncpa [#allocation12], 1 }
 0x77d   :  { %1918 = vsyncpa [#allocation4], 1 }
 0x77e   :  { %1920 = vsyncpa [#allocation4 + $0x1], 1 }

</bundles_post_ra>
